<compile_context>
chip_gen: v7x
topology: tpu7x:2x2x1
jax: 0.10.0
libtpu: 0.0.40
codegen_flags: <defaults>
</compile_context>

<pallas_src>
import jax
import jax.numpy as jnp
from jax.experimental import pallas as pl
from jax.experimental.pallas import tpu as pltpu

_H1 = 64     # hidden width of mlp1 layer 0
_H2 = 128    # hidden width of mlp1 layer 2 / pooled feature width


def _round_up(x, m):
    return -(-x // m) * m


def _mini_pointnet_kernel(x_ref, w1_ref, b1_ref, w2_ref, b2_ref,
                          w3_ref, b3_ref, o_ref, acc_ref):
    n = pl.program_id(1)

    # ---- init the running max at the first point tile of each batch tile ---
    @pl.when(n == 0)
    def _init():
        acc_ref[...] = jnp.full(acc_ref.shape, -jnp.inf, acc_ref.dtype)

    x = x_ref[...]                            # (bt, D_in, tn) f32, points on lanes
    bt, d_in, _ = x.shape

    # ---- mlp1 layer 0: Linear(D_in, 64) + ReLU ------------------------------
    # K = D_in is tiny (e.g. 8) -> VPU broadcast MACs: (64,1) weight column
    # times (bt,1,tn) point row -> (bt,64,tn); no contraction-starved matmul.
    if d_in <= 16:
        h = w1_ref[:, 0:1] * x[:, 0:1, :]
        for k in range(1, d_in):
            h = h + w1_ref[:, k:k + 1] * x[:, k:k + 1, :]
    else:
        w1b = jnp.broadcast_to(w1_ref[...][None], (bt,) + w1_ref.shape)
        h = jnp.einsum('bhk,bkt->bht', w1b, x,
                       preferred_element_type=jnp.float32)
    h = jnp.maximum(h + b1_ref[...], 0.0)     # (bt, 64, tn) f32

    # ---- mlp1 layer 2: Linear(64, 128) + ReLU (bf16 MXU, f32 accumulation) --
    hb = h.astype(jnp.bfloat16)
    w2b = jnp.broadcast_to(w2_ref[...][None], (bt,) + w2_ref.shape)   # bf16
    h2 = jnp.einsum('boh,bht->bot', w2b, hb,
                    preferred_element_type=jnp.float32)
    h2 = jnp.maximum(h2 + b2_ref[...], 0.0)   # (bt, 128, tn) f32

    # ---- pooling: one lane-axis max + one full-width accumulator update -----
    acc_ref[...] = jnp.maximum(acc_ref[...], jnp.max(h2, axis=-1))

    # ---- last point tile: mlp2 + lane-dense output store --------------------
    @pl.when(n == pl.num_programs(1) - 1)
    def _finalize():
        g = acc_ref[...]                                      # (bt, 128) f32
        o = jnp.dot(g, w3_ref[...], preferred_element_type=jnp.float32)
        o = jnp.maximum(o + b3_ref[...], 0.0)                 # (bt, D_out padded)
        o_ref[...] = o[None].astype(o_ref.dtype)


def mini_pointnet(points, params, *, tile_n=2048, tile_b=8):
    """points: (B, N, D_in) f32 -> (B, 1, D_out) f32 (matches the nn.Module)."""
    w1, b1, w2, b2, w3, b3 = params
    B, N, D_in = points.shape
    D_out = w3.shape[1]

    # Batch tiling: >= 2 batch tiles whenever B >= 2 so both v7x TensorCores
    # get work under the "parallel" batch grid axis.
    n_btiles = 1 if B == 1 else max(2, pl.cdiv(B, tile_b))
    bt = pl.cdiv(B, n_btiles)
    b_pad = bt * n_btiles

    # Point tiling: the point axis sits on the 128-wide lane dimension.
    tn = min(max(tile_n, 128), _round_up(N, 128))
    tn = max(128, (tn // 128) * 128)
    n_pad = _round_up(N, tn)
    n_tiles = n_pad // tn

    # Pad: batch rows with zeros (sliced off at the end); the point axis by
    # edge-replicating real points (exact under max-pooling; zero padding
    # would be WRONG: ReLU(b1)->layer2 of a zero row can exceed the true max).
    pts = jnp.asarray(points, jnp.float32)
    if n_pad != N:
        pts = jnp.pad(pts, ((0, 0), (0, n_pad - N), (0, 0)), mode='edge')
    if b_pad != B:
        pts = jnp.pad(pts, ((0, b_pad - B), (0, 0), (0, 0)))
    pts_t = jnp.transpose(pts, (0, 2, 1))            # (B, D_in, N): lane-dense

    # Weights in kernel-friendly layouts.
    w1t = jnp.asarray(w1, jnp.float32).T                        # (64, D_in)
    b1c = jnp.asarray(b1, jnp.float32).reshape(_H1, 1)          # (64, 1)
    w2t = jnp.asarray(w2, jnp.float32).T.astype(jnp.bfloat16)   # (128, 64) bf16
    b2c = jnp.asarray(b2, jnp.float32).reshape(_H2, 1)          # (128, 1)
    d_out_pad = _round_up(D_out, 128)
    w3p = jnp.zeros((_H2, d_out_pad), jnp.float32).at[:, :D_out].set(
        jnp.asarray(w3, jnp.float32))
    b3p = jnp.zeros((1, d_out_pad), jnp.float32).at[:, :D_out].set(
        jnp.asarray(b3, jnp.float32).reshape(1, D_out))

    def full(arr):
        return pl.BlockSpec(arr.shape, lambda b, n: (0,) * arr.ndim)

    flops = (2 * b_pad * n_pad * (D_in * _H1 + _H1 * _H2)
             + 2 * b_pad * _H2 * d_out_pad)
    bytes_accessed = int(4 * (pts_t.size + w1t.size + b1c.size + b2c.size
                              + w3p.size + b3p.size + b_pad * d_out_pad)
                         + 2 * w2t.size)

    # Right-sized VMEM limit: points double-buffer + resident weights +
    # in-kernel intermediates (h1 f32 + bf16, h2 f32 with x2 headroom for the
    # ReLU copy) + margin for compiler temporaries.  Well inside v7x's 64 MiB.
    interm_bytes = bt * tn * (_H1 * (4 + 2) + _H2 * (4 + 4))
    buf_bytes = 2 * bt * D_in * tn * 4 + 2 * bt * d_out_pad * 4
    wgt_bytes = 2 * (4 * (w1t.size + b1c.size + b2c.size + w3p.size + b3p.size)
                     + 2 * w2t.size)
    vmem_limit = int(min(max(interm_bytes + buf_bytes + wgt_bytes + (8 << 20),
                             16 << 20), 40 << 20))

    out = pl.pallas_call(
        _mini_pointnet_kernel,
        out_shape=jax.ShapeDtypeStruct((n_btiles, bt, d_out_pad), jnp.float32),
        grid_spec=pltpu.PrefetchScalarGridSpec(
            num_scalar_prefetch=0,
            grid=(n_btiles, n_tiles),
            in_specs=[
                pl.BlockSpec((bt, D_in, tn), lambda b, n: (b, 0, n)),  # points
                full(w1t), full(b1c),      # mlp1 layer 0
                full(w2t), full(b2c),      # mlp1 layer 2 (bf16 weight)
                full(w3p), full(b3p),      # mlp2 (lane-padded)
            ],
            out_specs=pl.BlockSpec((1, bt, d_out_pad), lambda b, n: (b, 0, 0)),
            scratch_shapes=[pltpu.VMEM((bt, _H2), jnp.float32)],
        ),
        compiler_params=pltpu.CompilerParams(
            dimension_semantics=("parallel", "arbitrary"),
            vmem_limit_bytes=vmem_limit),
        cost_estimate=pl.CostEstimate(
            flops=flops, transcendentals=0, bytes_accessed=bytes_accessed),
    )(pts_t, w1t, b1c, w2t, b2c, w3p, b3p)

    # Valid batch rows / output lanes; keepdim=1 like the nn.Module.
    return out.reshape(b_pad, d_out_pad)[:B, :D_out][:, None, :]


def init_params(key, input_dim, output_dim):
    """Deterministic PyTorch-style (uniform +/- 1/sqrt(fan_in)) init."""
    def linear(k, fan_in, fan_out):
        kw, kb = jax.random.split(k)
        bound = 1.0 / jnp.sqrt(float(fan_in))
        w = jax.random.uniform(kw, (fan_in, fan_out), jnp.float32, -bound, bound)
        b = jax.random.uniform(kb, (1, fan_out), jnp.float32, -bound, bound)
        return w, b

    k1, k2, k3 = jax.random.split(key, 3)
    w1, b1 = linear(k1, input_dim, _H1)
    w2, b2 = linear(k2, _H1, _H2)
    w3, b3 = linear(k3, _H2, output_dim)
    return (w1, b1, w2, b2, w3, b3)


def mini_pointnet_ref(points, params):
    """Pure-JAX reference for correctness checking."""
    w1, b1, w2, b2, w3, b3 = params
    h = jnp.maximum(points @ w1 + b1, 0.0)
    h = jnp.maximum(h @ w2 + b2, 0.0)
    g = jnp.max(h, axis=1, keepdims=True)
    return jnp.maximum(g @ w3 + b3, 0.0)


if __name__ == "__main__":
    key = jax.random.PRNGKey(0)
    k1, k2, k3, k4 = jax.random.split(key, 4)

    # Config 1: tiny shapes -> one point tile (edge-replicated up to 128
    # points), two single-row batch tiles (v7x megacore occupancy path).
    B, N, D_in, D_out = 2, 16, 8, 32
    pts = jax.random.normal(k1, (B, N, D_in), jnp.float32)
    params = init_params(k2, D_in, D_out)
    out = jax.block_until_ready(mini_pointnet(pts, params, tile_n=128, tile_b=8))
    ref = mini_pointnet_ref(pts, params)
    assert out.shape == (B, 1, D_out), out.shape
    # bf16 layer-2 matmul (f32 accumulation) -> relaxed tolerance.
    assert jnp.allclose(out, ref, atol=2e-2, rtol=2e-2), \
        float(jnp.max(jnp.abs(out - ref)))

    # Config 2: ragged sizes -> three point tiles (running-max accumulator +
    # replicated-point tail), two bt=5 batch tiles via the 3-D output slab.
    B2, N2 = 10, 300
    pts2 = jax.random.normal(k3, (B2, N2, D_in), jnp.float32)
    params2 = init_params(k4, D_in, D_out)
    out2 = jax.block_until_ready(mini_pointnet(pts2, params2, tile_n=128, tile_b=8))
    ref2 = mini_pointnet_ref(pts2, params2)
    assert out2.shape == (B2, 1, D_out), out2.shape
    assert jnp.allclose(out2, ref2, atol=2e-2, rtol=2e-2), \
        float(jnp.max(jnp.abs(out2 - ref2)))

    print("KERNEL_OK")
</pallas_src>

<mosaic_0001>
module attributes {stable_mosaic.version = 11 : i64} {
  func.func @_mini_pointnet_kernel(%arg0: i32, %arg1: i32, %arg2: memref<1x8x128xf32, #tpu.memory_space<vmem>>, %arg3: memref<64x8xf32, #tpu.memory_space<vmem>>, %arg4: memref<64x1xf32, #tpu.memory_space<vmem>>, %arg5: memref<128x64xbf16, #tpu.memory_space<vmem>>, %arg6: memref<128x1xf32, #tpu.memory_space<vmem>>, %arg7: memref<128x128xf32, #tpu.memory_space<vmem>>, %arg8: memref<1x128xf32, #tpu.memory_space<vmem>>, %arg9: memref<1x1x128xf32, #tpu.memory_space<vmem>>, %arg10: memref<1x128xf32, #tpu.memory_space<vmem>>) attributes {dimension_semantics = [#tpu.dimension_semantics<parallel>, #tpu.dimension_semantics<arbitrary>], iteration_bounds = array<i64: 2, 1>, scalar_prefetch = 0 : i64, scratch_operands = 1 : i64, tpu.core_type = #tpu.core_type<tc>, window_params = [{transform_indices = @transform_0, window_bounds = array<i64: 1, 8, 128>}, {pipeline_mode = #tpu.pipeline_mode<synchronous>, transform_indices = @transform_1, window_bounds = array<i64: 64, 8>}, {pipeline_mode = #tpu.pipeline_mode<synchronous>, transform_indices = @transform_2, window_bounds = array<i64: 64, 1>}, {pipeline_mode = #tpu.pipeline_mode<synchronous>, transform_indices = @transform_3, window_bounds = array<i64: 128, 64>}, {pipeline_mode = #tpu.pipeline_mode<synchronous>, transform_indices = @transform_4, window_bounds = array<i64: 128, 1>}, {pipeline_mode = #tpu.pipeline_mode<synchronous>, transform_indices = @transform_5, window_bounds = array<i64: 128, 128>}, {pipeline_mode = #tpu.pipeline_mode<synchronous>, transform_indices = @transform_6, window_bounds = array<i64: 1, 128>}, {transform_indices = @transform_7, window_bounds = array<i64: 1, 1, 128>}]} {
    %c0_i32 = arith.constant 0 : i32
    %0 = arith.cmpi eq, %arg1, %c0_i32 : i32
    %1 = arith.extui %0 : i1 to i32
    %c0_i32_0 = arith.constant 0 : i32
    %2 = arith.cmpi ne, %1, %c0_i32_0 : i32
    scf.if %2 {
      %cst_27 = arith.constant 0xFF800000 : f32
      %82 = vector.broadcast %cst_27 : f32 to vector<1x128xf32>
      %c0_28 = arith.constant 0 : index
      %c0_29 = arith.constant 0 : index
      %83 = vector.load %arg10[%c0_28, %c0_29] : memref<1x128xf32, #tpu.memory_space<vmem>>, vector<1x128xf32>
      tpu.vector_store %arg10[%c0_28, %c0_29], %82 {strides = array<i32>} : memref<1x128xf32, #tpu.memory_space<vmem>>, vector<1x128xf32>,
    } else {
    }
    %c0 = arith.constant 0 : index
    %c0_1 = arith.constant 0 : index
    %c0_2 = arith.constant 0 : index
    %3 = vector.load %arg2[%c0, %c0_1, %c0_2] : memref<1x8x128xf32, #tpu.memory_space<vmem>>, vector<1x8x128xf32>
    %c0_3 = arith.constant 0 : index
    %c0_4 = arith.constant 0 : index
    %4 = vector.load %arg3[%c0_3, %c0_4] : memref<64x8xf32, #tpu.memory_space<vmem>>, vector<64x1xf32>
    %5 = vector.extract_strided_slice %3 {offsets = [0, 0, 0], sizes = [1, 1, 128], strides = [1, 1, 1]} : vector<1x8x128xf32> to vector<1x1x128xf32>
    %6 = vector.shape_cast %4 : vector<64x1xf32> to vector<1x64x1xf32>
    %7 = vector.broadcast %6 : vector<1x64x1xf32> to vector<1x64x128xf32>
    %8 = vector.broadcast %5 : vector<1x1x128xf32> to vector<1x64x128xf32>
    %9 = arith.mulf %7, %8 : vector<1x64x128xf32>
    %c0_5 = arith.constant 0 : index
    %c1 = arith.constant 1 : index
    %10 = vector.load %arg3[%c0_5, %c1] : memref<64x8xf32, #tpu.memory_space<vmem>>, vector<64x1xf32>
    %11 = vector.extract_strided_slice %3 {offsets = [0, 1, 0], sizes = [1, 1, 128], strides = [1, 1, 1]} : vector<1x8x128xf32> to vector<1x1x128xf32>
    %12 = vector.shape_cast %10 : vector<64x1xf32> to vector<1x64x1xf32>
    %13 = vector.broadcast %12 : vector<1x64x1xf32> to vector<1x64x128xf32>
    %14 = vector.broadcast %11 : vector<1x1x128xf32> to vector<1x64x128xf32>
    %15 = arith.mulf %13, %14 : vector<1x64x128xf32>
    %16 = arith.addf %9, %15 : vector<1x64x128xf32>
    %c0_6 = arith.constant 0 : index
    %c2 = arith.constant 2 : index
    %17 = vector.load %arg3[%c0_6, %c2] : memref<64x8xf32, #tpu.memory_space<vmem>>, vector<64x1xf32>
    %18 = vector.extract_strided_slice %3 {offsets = [0, 2, 0], sizes = [1, 1, 128], strides = [1, 1, 1]} : vector<1x8x128xf32> to vector<1x1x128xf32>
    %19 = vector.shape_cast %17 : vector<64x1xf32> to vector<1x64x1xf32>
    %20 = vector.broadcast %19 : vector<1x64x1xf32> to vector<1x64x128xf32>
    %21 = vector.broadcast %18 : vector<1x1x128xf32> to vector<1x64x128xf32>
    %22 = arith.mulf %20, %21 : vector<1x64x128xf32>
    %23 = arith.addf %16, %22 : vector<1x64x128xf32>
    %c0_7 = arith.constant 0 : index
    %c3 = arith.constant 3 : index
    %24 = vector.load %arg3[%c0_7, %c3] : memref<64x8xf32, #tpu.memory_space<vmem>>, vector<64x1xf32>
    %25 = vector.extract_strided_slice %3 {offsets = [0, 3, 0], sizes = [1, 1, 128], strides = [1, 1, 1]} : vector<1x8x128xf32> to vector<1x1x128xf32>
    %26 = vector.shape_cast %24 : vector<64x1xf32> to vector<1x64x1xf32>
    %27 = vector.broadcast %26 : vector<1x64x1xf32> to vector<1x64x128xf32>
    %28 = vector.broadcast %25 : vector<1x1x128xf32> to vector<1x64x128xf32>
    %29 = arith.mulf %27, %28 : vector<1x64x128xf32>
    %30 = arith.addf %23, %29 : vector<1x64x128xf32>
    %c0_8 = arith.constant 0 : index
    %c4 = arith.constant 4 : index
    %31 = vector.load %arg3[%c0_8, %c4] : memref<64x8xf32, #tpu.memory_space<vmem>>, vector<64x1xf32>
    %32 = vector.extract_strided_slice %3 {offsets = [0, 4, 0], sizes = [1, 1, 128], strides = [1, 1, 1]} : vector<1x8x128xf32> to vector<1x1x128xf32>
    %33 = vector.shape_cast %31 : vector<64x1xf32> to vector<1x64x1xf32>
    %34 = vector.broadcast %33 : vector<1x64x1xf32> to vector<1x64x128xf32>
    %35 = vector.broadcast %32 : vector<1x1x128xf32> to vector<1x64x128xf32>
    %36 = arith.mulf %34, %35 : vector<1x64x128xf32>
    %37 = arith.addf %30, %36 : vector<1x64x128xf32>
    %c0_9 = arith.constant 0 : index
    %c5 = arith.constant 5 : index
    %38 = vector.load %arg3[%c0_9, %c5] : memref<64x8xf32, #tpu.memory_space<vmem>>, vector<64x1xf32>
    %39 = vector.extract_strided_slice %3 {offsets = [0, 5, 0], sizes = [1, 1, 128], strides = [1, 1, 1]} : vector<1x8x128xf32> to vector<1x1x128xf32>
    %40 = vector.shape_cast %38 : vector<64x1xf32> to vector<1x64x1xf32>
    %41 = vector.broadcast %40 : vector<1x64x1xf32> to vector<1x64x128xf32>
    %42 = vector.broadcast %39 : vector<1x1x128xf32> to vector<1x64x128xf32>
    %43 = arith.mulf %41, %42 : vector<1x64x128xf32>
    %44 = arith.addf %37, %43 : vector<1x64x128xf32>
    %c0_10 = arith.constant 0 : index
    %c6 = arith.constant 6 : index
    %45 = vector.load %arg3[%c0_10, %c6] : memref<64x8xf32, #tpu.memory_space<vmem>>, vector<64x1xf32>
    %46 = vector.extract_strided_slice %3 {offsets = [0, 6, 0], sizes = [1, 1, 128], strides = [1, 1, 1]} : vector<1x8x128xf32> to vector<1x1x128xf32>
    %47 = vector.shape_cast %45 : vector<64x1xf32> to vector<1x64x1xf32>
    %48 = vector.broadcast %47 : vector<1x64x1xf32> to vector<1x64x128xf32>
    %49 = vector.broadcast %46 : vector<1x1x128xf32> to vector<1x64x128xf32>
    %50 = arith.mulf %48, %49 : vector<1x64x128xf32>
    %51 = arith.addf %44, %50 : vector<1x64x128xf32>
    %c0_11 = arith.constant 0 : index
    %c7 = arith.constant 7 : index
    %52 = vector.load %arg3[%c0_11, %c7] : memref<64x8xf32, #tpu.memory_space<vmem>>, vector<64x1xf32>
    %53 = vector.extract_strided_slice %3 {offsets = [0, 7, 0], sizes = [1, 1, 128], strides = [1, 1, 1]} : vector<1x8x128xf32> to vector<1x1x128xf32>
    %54 = vector.shape_cast %52 : vector<64x1xf32> to vector<1x64x1xf32>
    %55 = vector.broadcast %54 : vector<1x64x1xf32> to vector<1x64x128xf32>
    %56 = vector.broadcast %53 : vector<1x1x128xf32> to vector<1x64x128xf32>
    %57 = arith.mulf %55, %56 : vector<1x64x128xf32>
    %58 = arith.addf %51, %57 : vector<1x64x128xf32>
    %c0_12 = arith.constant 0 : index
    %c0_13 = arith.constant 0 : index
    %59 = vector.load %arg4[%c0_12, %c0_13] : memref<64x1xf32, #tpu.memory_space<vmem>>, vector<64x1xf32>
    %60 = vector.shape_cast %59 : vector<64x1xf32> to vector<1x64x1xf32>
    %61 = vector.broadcast %60 : vector<1x64x1xf32> to vector<1x64x128xf32>
    %62 = arith.addf %58, %61 : vector<1x64x128xf32>
    %cst = arith.constant 0.000000e+00 : f32
    %63 = vector.broadcast %cst : f32 to vector<1x64x128xf32>
    %64 = arith.maximumf %62, %63 : vector<1x64x128xf32>
    %65 = arith.truncf %64 : vector<1x64x128xf32> to vector<1x64x128xbf16>
    %c0_14 = arith.constant 0 : index
    %c0_15 = arith.constant 0 : index
    %66 = vector.load %arg5[%c0_14, %c0_15] : memref<128x64xbf16, #tpu.memory_space<vmem>>, vector<128x64xbf16>
    %67 = vector.shape_cast %66 : vector<128x64xbf16> to vector<1x128x64xbf16>
    "tpu.trace_start"() <{level = 10 : i32, message = "boh,bht->bot"}> : () -> ()
    %cst_16 = arith.constant dense<0.000000e+00> : vector<1x128x128xf32>
    %68 = tpu.matmul %67, %65, %cst_16 {dimension_numbers = #tpu.dot_dimension_numbers<[2], [1], [1], [2], [0, 0, 0, 1, 1, 2], [0], [0]>} : vector<1x128x64xbf16>, vector<1x64x128xbf16>, vector<1x128x128xf32> -> vector<1x128x128xf32>
    "tpu.trace_stop"() : () -> ()
    %c0_17 = arith.constant 0 : index
    %c0_18 = arith.constant 0 : index
    %69 = vector.load %arg6[%c0_17, %c0_18] : memref<128x1xf32, #tpu.memory_space<vmem>>, vector<128x1xf32>
    %70 = vector.shape_cast %69 : vector<128x1xf32> to vector<1x128x1xf32>
    %71 = vector.broadcast %70 : vector<1x128x1xf32> to vector<1x128x128xf32>
    %72 = arith.addf %68, %71 : vector<1x128x128xf32>
    %cst_19 = arith.constant 0.000000e+00 : f32
    %73 = vector.broadcast %cst_19 : f32 to vector<1x128x128xf32>
    %74 = arith.maximumf %72, %73 : vector<1x128x128xf32>
    %c0_20 = arith.constant 0 : index
    %c0_21 = arith.constant 0 : index
    %75 = vector.load %arg10[%c0_20, %c0_21] : memref<1x128xf32, #tpu.memory_space<vmem>>, vector<1x128xf32>
    %cst_22 = arith.constant dense<0xFF800000> : vector<1x128xf32>
    %76 = vector.multi_reduction <maximumf>, %74, %cst_22 [2] : vector<1x128x128xf32> to vector<1x128xf32>
    %77 = arith.maximumf %75, %76 : vector<1x128xf32>
    %c0_23 = arith.constant 0 : index
    %c0_24 = arith.constant 0 : index
    %78 = vector.load %arg10[%c0_23, %c0_24] : memref<1x128xf32, #tpu.memory_space<vmem>>, vector<1x128xf32>
    tpu.vector_store %arg10[%c0_23, %c0_24], %77 {strides = array<i32>} : memref<1x128xf32, #tpu.memory_space<vmem>>, vector<1x128xf32>,
    %c0_i32_25 = arith.constant 0 : i32
    %79 = arith.cmpi eq, %arg1, %c0_i32_25 : i32
    %80 = arith.extui %79 : i1 to i32
    %c0_i32_26 = arith.constant 0 : i32
    %81 = arith.cmpi ne, %80, %c0_i32_26 : i32
    scf.if %81 {
      %c0_27 = arith.constant 0 : index
      %c0_28 = arith.constant 0 : index
      %82 = vector.load %arg10[%c0_27, %c0_28] : memref<1x128xf32, #tpu.memory_space<vmem>>, vector<1x128xf32>
      %c0_29 = arith.constant 0 : index
      %c0_30 = arith.constant 0 : index
      %83 = vector.load %arg7[%c0_29, %c0_30] : memref<128x128xf32, #tpu.memory_space<vmem>>, vector<128x128xf32>
      %cst_31 = arith.constant dense<0.000000e+00> : vector<1x128xf32>
      %84 = tpu.matmul %82, %83, %cst_31 {dimension_numbers = #tpu.dot_dimension_numbers<[1], [0], [0], [1], [0, 0, 1, 1], [], []>} : vector<1x128xf32>, vector<128x128xf32>, vector<1x128xf32> -> vector<1x128xf32>
      %c0_32 = arith.constant 0 : index
      %c0_33 = arith.constant 0 : index
      %85 = vector.load %arg8[%c0_32, %c0_33] : memref<1x128xf32, #tpu.memory_space<vmem>>, vector<1x128xf32>
      %86 = arith.addf %84, %85 : vector<1x128xf32>
      %cst_34 = arith.constant 0.000000e+00 : f32
      %87 = vector.broadcast %cst_34 : f32 to vector<1x128xf32>
      %88 = arith.maximumf %86, %87 : vector<1x128xf32>
      %89 = vector.shape_cast %88 : vector<1x128xf32> to vector<1x1x128xf32>
      %c0_35 = arith.constant 0 : index
      %c0_36 = arith.constant 0 : index
      %c0_37 = arith.constant 0 : index
      %90 = vector.load %arg9[%c0_35, %c0_36, %c0_37] : memref<1x1x128xf32, #tpu.memory_space<vmem>>, vector<1x1x128xf32>
      tpu.vector_store %arg9[%c0_35, %c0_36, %c0_37], %89 {strides = array<i32>} : memref<1x1x128xf32, #tpu.memory_space<vmem>>, vector<1x1x128xf32>,
    } else {
    }
    return
  }
  func.func @transform_0(%arg0: i32, %arg1: i32) -> (i32, i32, i32) {
    %c0_i32 = arith.constant 0 : i32
    %c0_i32_0 = arith.constant 0 : i32
    return %arg0, %c0_i32, %arg1 : i32, i32, i32
  }
  func.func @transform_1(%arg0: i32, %arg1: i32) -> (i32, i32) {
    %c0_i32 = arith.constant 0 : i32
    %c0_i32_0 = arith.constant 0 : i32
    %c0_i32_1 = arith.constant 0 : i32
    return %c0_i32, %c0_i32_0 : i32, i32
  }
  func.func @transform_2(%arg0: i32, %arg1: i32) -> (i32, i32) {
    %c0_i32 = arith.constant 0 : i32
    %c0_i32_0 = arith.constant 0 : i32
    %c0_i32_1 = arith.constant 0 : i32
    return %c0_i32, %c0_i32_0 : i32, i32
  }
  func.func @transform_3(%arg0: i32, %arg1: i32) -> (i32, i32) {
    %c0_i32 = arith.constant 0 : i32
    %c0_i32_0 = arith.constant 0 : i32
    %c0_i32_1 = arith.constant 0 : i32
    return %c0_i32, %c0_i32_0 : i32, i32
  }
  func.func @transform_4(%arg0: i32, %arg1: i32) -> (i32, i32) {
    %c0_i32 = arith.constant 0 : i32
    %c0_i32_0 = arith.constant 0 : i32
    %c0_i32_1 = arith.constant 0 : i32
    return %c0_i32, %c0_i32_0 : i32, i32
  }
  func.func @transform_5(%arg0: i32, %arg1: i32) -> (i32, i32) {
    %c0_i32 = arith.constant 0 : i32
    %c0_i32_0 = arith.constant 0 : i32
    %c0_i32_1 = arith.constant 0 : i32
    return %c0_i32, %c0_i32_0 : i32, i32
  }
  func.func @transform_6(%arg0: i32, %arg1: i32) -> (i32, i32) {
    %c0_i32 = arith.constant 0 : i32
    %c0_i32_0 = arith.constant 0 : i32
    %c0_i32_1 = arith.constant 0 : i32
    return %c0_i32, %c0_i32_0 : i32, i32
  }
  func.func @transform_7(%arg0: i32, %arg1: i32) -> (i32, i32, i32) {
    %c0_i32 = arith.constant 0 : i32
    %c0_i32_0 = arith.constant 0 : i32
    %c0_i32_1 = arith.constant 0 : i32
    return %arg0, %c0_i32, %c0_i32_0 : i32, i32, i32
  }
}

</mosaic_0001>

<bundles_post_ra>
// kernel: tpu_custom_call.1
= control target key start
LH: loop header
LB: loop body
LE: loop exit
PB: predicated region body
PF: predicated region fallthrough
CT: control target
= control target key end

     0   :  { %12 = vsyncpa [#allocation4], 0  ;;  %s4082_s0 = inlined_call_operand.vmem [shape: f32[2,8,128], index: 0, kind: input, shape index: {}]   ;;  %s4083_s1 = inlined_call_operand.vmem [shape: f32[64,8], index: 1, kind: input, shape index: {}]   ;;  %s4084_s2 = inlined_call_operand.vmem [shape: f32[64,1], index: 2, kind: input, shape index: {}]   ;;  %s4085_s3 = inlined_call_operand.vmem [shape: bf16[128,64], index: 3, kind: input, shape index: {}]   ;;  %s4086_s4 = inlined_call_operand.vmem [shape: f32[128,1], index: 4, kind: input, shape index: {}]   ;;  %s4087_s5 = inlined_call_operand.vmem [shape: f32[128,128], index: 5, kind: input, shape index: {}]   ;;  %s4088_s6 = inlined_call_operand.vmem [shape: f32[1,128], index: 6, kind: input, shape index: {}]   ;;  %s4089_s7 = inlined_call_operand.hbm [shape: f32[2,1,128], index: 7, kind: output, shape index: {}]  }
   0x1   :  { %14 = vsyncpa [#allocation4 + $0x1], 0  ;;  %s3168_s24 = smov 0   ;;  %s3170_s25 = smov 0  }
   0x2   :  { %s3172_s26 = smov 0   ;;  %s3174_s27 = smov 0  }
   0x3   :  { %s3176_s28 = smov 0   ;;  %s3178_s29 = smov 0  }
   0x4 LB: > { %s2778_s30 = sadd.s32 4294967295, %s3112_s29   ;;  %s2779_s8 = sadd.s32 4294967294, %s3112_s29   ;;  %s3112_s29 = sphi %s3178_s29, %s20_s29   ;;  %s3108_s28 = sphi %s3176_s28, %s4098_s28   ;;  %s3104_s27 = sphi %s3174_s27, %s4097_s27   ;;  %s3100_s26 = sphi %s3172_s26, %s4096_s26   ;;  %s3096_s25 = sphi %s3170_s25, %s4095_s25   ;;  %s3092_s24 = sphi %s3168_s24, %s4094_s24  }
   0x5   : > { %s32_s9 = sadd.s32 1, %s3108_s28  ;;  %s193_s10 = sadd.s32 1, %s3100_s26 }
   0x6   : > { %p34_p0 = scmp.ge.s32.totalorder %s32_s9, 2  ;;  %p203_p1 = scmp.ne.s32.totalorder %s3100_s26, %s3096_s25 }
   0x7   : > { %p204_p2 = scmp.eq.s32.totalorder %s2778_s30, 1  ;;  %p209_p3 = scmp.ne.s32.totalorder %s3096_s25, %s3092_s24 }
   0x8   : > { %s4100_s9 = smov (%p34_p0, %s32_s9), 0  ;;  %p210_p5 = scmp.eq.s32.totalorder %s2779_s8, 1 }
   0x9   : > { %p3208_p4 = por %p204_p2, %p203_p1  ;;  %s190_s12 = ssub.s32 %s3108_s28, %s4100_s9 }
   0xa   : > { %p2782_p6 = scmp.ge.s32.totalorder %s3112_s29, 1  ;;  %p191_p7 = scmp.eq.s32.totalorder %s190_s12, 0 }
   0xb   : > { %p3215_p8 = por %p210_p5, %p209_p3  ;;  %p256_p9 = scmp.lt.s32.totalorder %s3112_s29, 3 }
   0xc   : > { %s3221_s14 = scalar_select %p191_p7, %s3100_s26, %s193_s10  }
   0xd   : > { %p257_p10 = pnand %p2782_p6, %p256_p9 }
   0xe   : > { %v3226_v0 = vld [vmem:[%s4083_s1 + $0x28] sm:$0xff] (!%p257_p10)  ;;  %v3231_v1 = vld [vmem:[%s4083_s1] sm:$0xff] (!%p257_p10)  ;;  %v3114_v2 = vmov (!%p257_p10), 1   ;;  %v3115_v4 = vmov (!%p257_p10), 2   ;;  %v3248_v5 = vld [vmem:[%s4083_s1 + $0x18] sm:$0xff] (!%p257_p10)  ;;  %v3116_v7 = vmov (!%p257_p10), 0   ;;  %v4090_v39 = vlaneseq (!%p257_p10) }
   0xf   : > { %260 = sbr.rel (%p257_p10) target bundleno = 1195 (0x4ab), region = 48  ;;  %2992 = vset.pattern.permute.xlu0 (!%p257_p10), %v3114_v2  ;;  %2983 = vset.pattern.permute.xlu1 (!%p257_p10), %v3114_v2  ;;  %v3240_v3 = vld [vmem:[%s4083_s1 + $0x8] sm:$0xff] (!%p257_p10)  ;;  %v3256_v6 = vld [vmem:[%s4083_s1 + $0x10] sm:$0xff] (!%p257_p10)  ;;  %v3117_v9 = vmov (!%p257_p10), 3   ;;  %v3275_v10 = vld [vmem:[%s4083_s1 + $0x20] sm:$0xff] (!%p257_p10)  ;;  %v3118_v11 = vmov (!%p257_p10), 4  }
  0x10   : > { %384 = vperm.xlu0 (!%p257_p10), %2992, %v3226_v0   ;;  %364 = vperm.xlu1 (!%p257_p10), %2983, %v3231_v1   ;;  %v3264_v8 = vld [vmem:[%s4083_s1 + $0x30] sm:$0xff] (!%p257_p10)  ;;  %v3296_v12 = vld [vmem:[%s4083_s1 + $0x38] sm:$0xff] (!%p257_p10)  ;;  %v727_v13 = vld [vmem:[%s4084_s2] sm:$0xff] (!%p257_p10)  ;;  %v3119_v14 = vmov (!%p257_p10), 5   ;;  %v3120_v15 = vmov (!%p257_p10), 6   ;;  %v3121_v16 = vmov (!%p257_p10), 7  }
  0x11   : > { %v733_v17 = vld [vmem:[%s4084_s2 + $0x30] sm:$0xff] (!%p257_p10)  ;;  %v812_v18 = vld [vmem:[%s4086_s4 + $0x8] sm:$0xff] (!%p257_p10)  ;;  %v814_v19 = vld [vmem:[%s4086_s4 + $0x18] sm:$0xff] (!%p257_p10)  ;;  %p289_p11 = scmp.lt.s32.totalorder (!%p257_p10), %s3104_s27, 1  ;;  %v3415_v42 = vshrl.u32 (!%p257_p10), %v4090_v39, 7  ;;  %vm947_vm0 = vcmask (!%p257_p10), 523264  }
  0x12   : > { %v816_v20 = vld [vmem:[%s4086_s4 + $0x28] sm:$0xff] (!%p257_p10)  ;;  %v818_v21 = vld [vmem:[%s4086_s4 + $0x38] sm:$0xff] (!%p257_p10)  ;;  %vm3125_vm1 = vmmov (!%p257_p10), 0   ;;  %vm2489_vm2 = vcmask (!%p257_p10), 130112   ;;  %vm2496_vm3 = vcmask (!%p257_p10), 195712   ;;  %vm2503_vm4 = vcmask (!%p257_p10), 261312  }
  0x13   : > { %v820_v22 = vld [vmem:[%s4086_s4 + $0x48] sm:$0xff] (!%p257_p10)  ;;  %v822_v23 = vld [vmem:[%s4086_s4 + $0x58] sm:$0xff] (!%p257_p10)  ;;  %v3425_v45 = vsub.s32 (!%p257_p10), 1, %v3415_v42  ;;  %v3430_v47 = vsub.s32 (!%p257_p10), 2, %v3415_v42  ;;  %v3433_v48 = vsub.s32 (!%p257_p10), 0, %v3415_v42  ;;  %vm2510_vm5 = vcmask (!%p257_p10), 326912  }
  0x14   : > { %2993 = vset.pattern.permute.xlu0 (!%p257_p10), %v3115_v4  ;;  %368 = vperm.xlu1 (!%p257_p10), %2983, %v3240_v3   ;;  %v824_v25 = vld [vmem:[%s4086_s4 + $0x68] sm:$0xff] (!%p257_p10)  ;;  %v826_v28 = vld [vmem:[%s4086_s4 + $0x78] sm:$0xff] (!%p257_p10)  ;;  %vm2517_vm6 = vcmask (!%p257_p10), 392512   ;;  %vm2524_vm7 = vcmask (!%p257_p10), 458112   ;;  %vm2531_vm8 = vcmask (!%p257_p10), 523712   ;;  %vm2538_vm9 = vcmask (!%p257_p10), 589312  }
  0x15   : > { %416 = vperm.xlu0 (!%p257_p10), %2993, %v3231_v1   ;;  %v728_v38 = vld [vmem:[%s4084_s2 + $0x8] sm:$0xff] (!%p257_p10)  ;;  %vm2545_vm10 = vcmask (!%p257_p10), 654912   ;;  %vm2552_vm11 = vcmask (!%p257_p10), 720512   ;;  %vm2559_vm12 = vcmask (!%p257_p10), 786112   ;;  %vm2566_vm13 = vcmask (!%p257_p10), 851712  }
  0x16   : > { %s290_s8 = scalar_select %p289_p11, %s3104_s27, 1  ;;  %vm2573_vm14 = vcmask 917312   ;;  %vm2580_vm15 = vcmask 982912  }
  0x18   : > { %2984 = vset.pattern.permute.xlu1 %v3115_v4  ;;  %s2783_s15 = sshll.u32 %s290_s8, 3 }
  0x19   : > { %428 = vperm.xlu0 %2993, %v3248_v5   ;;  %420 = vperm.xlu1 %2984, %v3240_v3   ;;  %s295_s18 = scalar_lea.vmem %s4082_s0, %s2783_s15  ;;  %s287_s15 = sand.u32 1, %s3096_s25  }
  0x1a   : > { %v3427_v46 = vld [vmem:[%s295_s18] sm:$0xff]  ;;  %s2800_s18 = sshll.u32 %s3104_s27, 4  ;;  %s288_s19 = scalar_lea.vmem [#allocation3], %s287_s15 }
  0x1b   : > { %v3440_v50 = vrot.slane %v3427_v46, %v3425_v45  ;;  %v3446_v53 = vrot.slane %v3427_v46, %v3430_v47  ;;  %v3450_v54 = vrot.slane %v3427_v46, %v3433_v48  ;;  %s2712_s20 = sshll.u32 %s288_s19, 4  ;;  %s4035_s23 = scalar_lea.hbm %s4089_s7, %s2800_s18  ;;  %s4037_s20 = int_to_ptr.vmem [resolvable:$true] %s2712_s20 }
  0x1c   : > { %s2700_s30 = scalar_lea.sflag [#allocation4], %s287_s15  ;;  %s3034_s8 = scalar_lea.vmem %s4037_s20, 16 }
  0x1d   : > { %436 = vperm.xlu0 %2993, %v3226_v0   ;;  %2985 = vset.pattern.permute.xlu1 %v3116_v7  ;;  %p3035_p12 = scmp.ne.s32.totalorder %s4037_s20, %s3034_s8  ;;  %s3127_s27 = smov [#allocation3]  }
  0x1e   : > { %323 = vperm.xlu1 %2985, %v3256_v6   ;;  %s3038_s10 = sshll.u32 %s3127_s27, 4  ;;  %s3039_s10 = int_to_ptr.vmem [resolvable:$false] %s3038_s10 }
  0x1f   : > { %p3036_p13 = pnand %p3035_p12, %p3208_p4  ;;  %s3040_s12 = scalar_lea.vmem %s3039_s10, 32 }
  0x20   : > { %p3041_p1 = scmp.lt.s32.totalorder %s4037_s20, %s3039_s10  ;;  %p3042_p2 = scmp.lt.s32.totalorder %s3040_s12, %s3034_s8 }
  0x21   : > { %440 = vperm.xlu0 %2993, %v3264_v8   ;;  %p3037_p0 = pneg %p3036_p13 }
  0x22   : > { %2986 = vset.pattern.permute.xlu1 %v3114_v2  ;;  %p3043_p3 = por %p3042_p2, %p3041_p1 }
  0x23   : > { %372 = vperm.xlu1 %2986, %v3256_v6  }
  0x24   : > { %p3044_p5 = pnand %p3043_p3, %p3037_p0 }
  0x25   : > { %3004 = vset.pattern.permute.xlu0 %v3117_v9 }
  0x26   : > { %468 = vperm.xlu0 %3004, %v3231_v1  }
  0x27   : > { %376 = vperm.xlu1 %2986, %v3248_v5  }
  0x2a   : > { %484 = vperm.xlu0 %3004, %v3275_v10  }
  0x2b   : > { %2987 = vset.pattern.permute.xlu1 %v3117_v9 }
  0x2c   : > { %472 = vperm.xlu1 %2987, %v3240_v3  }
  0x2e   : > { %492 = vperm.xlu0 %3004, %v3264_v8  }
  0x30   : > { %2988 = vset.pattern.permute.xlu1 %v3115_v4 }
  0x31   : > { %424 = vperm.xlu1 %2988, %v3256_v6  }
  0x32   : > { %3008 = vset.pattern.permute.xlu0 %v3116_v7 }
  0x33   : > { %313 = vperm.xlu0 %3008, %v3231_v1  }
  0x35   : > { %2989 = vset.pattern.permute.xlu1 %v3118_v11 }
  0x36   : > { %520 = vperm.xlu1 %2989, %v3231_v1  }
  0x37   : > { %318 = vperm.xlu0 %3008, %v3240_v3  }
  0x3a   : > { %524 = vperm.xlu1 %2989, %v3240_v3  }
  0x3b   : > { %328 = vperm.xlu0 %3008, %v3248_v5  }
  0x3e   : > { %2990 = vset.pattern.permute.xlu1 %v3116_v7 }
  0x3f   : > { %333 = vperm.xlu0 %3008, %v3275_v10   ;;  %338 = vperm.xlu1 %2990, %v3226_v0  }
  0x43   : > { %348 = vperm.xlu0 %3008, %v3296_v12   ;;  %2991 = vset.pattern.permute.xlu1 %v3114_v2 }
  0x44   : > { %380 = vperm.xlu1 %2991, %v3275_v10  }
  0x47   : > { %737 = vperm.xlu0 %3008, %v727_v13  }
  0x48   : > { %2994 = vset.pattern.permute.xlu1 %v3117_v9 }
  0x49   : > { %476 = vperm.xlu1 %2994, %v3256_v6  }
  0x4b   : > { %3012 = vset.pattern.permute.xlu0 %v3118_v11 }
  0x4c   : > { %540 = vperm.xlu0 %3012, %v3226_v0  }
  0x4d   : > { %480 = vperm.xlu1 %2994, %v3248_v5  }
  0x50   : > { %548 = vperm.xlu0 %3012, %v3296_v12  }
  0x51   : > { %2995 = vset.pattern.permute.xlu1 %v3119_v14 }
  0x52   : > { %576 = vperm.xlu1 %2995, %v3240_v3  }
  0x54   : > { %3015 = vset.pattern.permute.xlu0 %v3119_v14 }
  0x55   : > { %572 = vperm.xlu0 %3015, %v3231_v1  }
  0x56   : > { %2996 = vset.pattern.permute.xlu1 %v3115_v4 }
  0x57   : > { %432 = vperm.xlu1 %2996, %v3275_v10  }
  0x59   : > { %584 = vperm.xlu0 %3015, %v3248_v5  }
  0x5b   : > { %2997 = vset.pattern.permute.xlu1 %v3118_v11 }
  0x5c   : > { %528 = vperm.xlu1 %2997, %v3256_v6  }
  0x5d   : > { %592 = vperm.xlu0 %3015, %v3226_v0  }
  0x60   : > { %532 = vperm.xlu1 %2997, %v3248_v5  }
  0x61   : > { %596 = vperm.xlu0 %3015, %v3264_v8  }
  0x64   : > { %2998 = vset.pattern.permute.xlu1 %v3120_v15 }
  0x65   : > { %3017 = vset.pattern.permute.xlu0 %v3120_v15  ;;  %628 = vperm.xlu1 %2998, %v3240_v3  }
  0x66   : > { %624 = vperm.xlu0 %3017, %v3231_v1  }
  0x69   : > { %2999 = vset.pattern.permute.xlu1 %v3116_v7 }
  0x6a   : > { %343 = vperm.xlu1 %2999, %v3264_v8   ;;  %648 = vperm.xlu0 %3017, %v3264_v8  }
  0x6e   : > { %3000 = vset.pattern.permute.xlu1 %v3114_v2  ;;  %3021 = vset.pattern.permute.xlu0 %v3121_v16 }
  0x6f   : > { %388 = vperm.xlu1 %3000, %v3264_v8   ;;  %696 = vperm.xlu0 %3021, %v3226_v0  }
  0x73   : > { %392 = vperm.xlu1 %3000, %v3296_v12   ;;  %704 = vperm.xlu0 %3021, %v3296_v12  }
  0x77   : > { %3001 = vset.pattern.permute.xlu1 %v3117_v9  ;;  %3025 = vset.pattern.permute.xlu0 %v3116_v7 }
  0x78   : > { %488 = vperm.xlu1 %3001, %v3226_v0   ;;  %767 = vperm.xlu0 %3025, %v733_v17  }
  0x7c   : > { %3002 = vset.pattern.permute.xlu1 %v3119_v14  ;;  %834 = vperm.xlu0 %3025, %v812_v18  }
  0x7d   : > { %580 = vperm.xlu1 %3002, %v3256_v6  }
  0x80   : > { %844 = vperm.xlu0 %3025, %v814_v19  }
  0x81   : > { %3003 = vset.pattern.permute.xlu1 %v3121_v16 }
  0x82   : > { %676 = vperm.xlu1 %3003, %v3231_v1  }
  0x84   : > { %854 = vperm.xlu0 %3025, %v816_v20  }
  0x86   : > { %680 = vperm.xlu1 %3003, %v3240_v3   ;;  %v730_v3 = vld [vmem:[%s4084_s2 + $0x18] sm:$0xff] }
  0x88   : > { %864 = vperm.xlu0 %3025, %v818_v21  }
  0x8a   : > { %3005 = vset.pattern.permute.xlu1 %v3115_v4  ;;  %v3479_v4 = vsub.s32 3, %v3415_v42 }
  0x8b   : > { %444 = vperm.xlu1 %3005, %v3296_v12  }
  0x8c   : > { %874 = vperm.xlu0 %3025, %v820_v22  }
  0x8f   : > { %3006 = vset.pattern.permute.xlu1 %v3118_v11  ;;  %v3367_v24 = vpop.permute.xlu1 %364  ;;  %v385_v26 = vpop.permute.xlu0 %384 }
  0x90   : > { %536 = vperm.xlu1 %3006, %v3275_v10   ;;  %884 = vperm.xlu0 %3025, %v822_v23   ;;  %v404_v52 = vmul.f32 %v3440_v50, %v385_v26 }
  0x93   : > { %v3373_v27 = vpop.permute.xlu1 %368 }
  0x94   : > { %3007 = vset.pattern.permute.xlu1 %v3120_v15  ;;  %894 = vperm.xlu0 %3025, %v824_v25   ;;  %v3380_v29 = vpop.permute.xlu0 %416  ;;  %v811_v25 = vld [vmem:[%s4086_s4] sm:$0xff] }
  0x95   : > { %632 = vperm.xlu1 %3007, %v3256_v6  }
  0x98   : > { %v3382_v30 = vpop.permute.xlu1 %420  ;;  %904 = vperm.xlu0 %3025, %v826_v28   ;;  %v3388_v32 = vpop.permute.xlu0 %428  ;;  %v813_v28 = vld [vmem:[%s4086_s4 + $0x10] sm:$0xff] }
  0x99   : > { %636 = vperm.xlu1 %3007, %v3248_v5  }
  0x9c   : > { %v437_v34 = vpop.permute.xlu0 %436 }
  0x9d   : > { %3009 = vset.pattern.permute.xlu1 %v3117_v9  ;;  %v3386_v31 = vpop.permute.xlu1 %323  ;;  %v456_v56 = vmul.f32 %v3446_v53, %v437_v34 }
  0x9e   : > { %496 = vperm.xlu1 %3009, %v3296_v12  }
  0xa0   : > { %v3400_v36 = vpop.permute.xlu0 %440 }
  0xa1   : > { %v457_v34 = vmul.f32 %v3446_v53, %v3400_v36  ;;  %v815_v36 = vld [vmem:[%s4086_s4 + $0x20] sm:$0xff] }
  0xa2   : > { %3010 = vset.pattern.permute.xlu1 %v3119_v14  ;;  %v3392_v33 = vpop.permute.xlu1 %372 }
  0xa3   : > { %588 = vperm.xlu1 %3010, %v3275_v10  }
  0xa5   : > { %v3409_v40 = vpop.permute.xlu0 %468 }
  0xa6   : > { %v3395_v35 = vpop.permute.xlu1 %376 }
  0xa7   : > { %3011 = vset.pattern.permute.xlu1 %v3121_v16 }
  0xa8   : > { %684 = vperm.xlu1 %3011, %v3256_v6  }
  0xa9   : > { %v485_v44 = vpop.permute.xlu0 %484 }
  0xab   : > { %v3402_v37 = vpop.permute.xlu1 %472 }
  0xac   : > { %688 = vperm.xlu1 %3011, %v3248_v5  }
  0xad   : > { %v493_v51 = vpop.permute.xlu0 %492 }
  0xb0   : > { %3013 = vset.pattern.permute.xlu1 %v3116_v7  ;;  %v3412_v41 = vpop.permute.xlu1 %424 }
  0xb1   : > { %742 = vperm.xlu1 %3013, %v728_v38  }
  0xb2   : > { %v3455_v59 = vpop.permute.xlu0 %313 }
  0xb5   : > { %3014 = vset.pattern.permute.xlu1 %v3118_v11  ;;  %v3421_v43 = vpop.permute.xlu1 %520  ;;  %v3487_v11 = vrot.slane %v3427_v46, %v3479_v4 }
  0xb6   : > { %544 = vperm.xlu1 %3014, %v3264_v8   ;;  %v3461_v62 = vpop.permute.xlu0 %318 }
  0xb9   : > { %v3435_v49 = vpop.permute.xlu1 %524 }
  0xba   : > { %3016 = vset.pattern.permute.xlu1 %v3120_v15  ;;  %v3473_v2 = vpop.permute.xlu0 %328 }
  0xbb   : > { %640 = vperm.xlu1 %3016, %v3275_v10  }
  0xbe   : > { %v339_v55 = vpop.permute.xlu1 %338  ;;  %v334_v6 = vpop.permute.xlu0 %333 }
  0xbf   : > { %v360_v57 = vmul.f32 %v3450_v54, %v339_v55  ;;  %644 = vperm.xlu1 %3016, %v3226_v0   ;;  %v729_v0 = vld [vmem:[%s4084_s2 + $0x10] sm:$0xff]  ;;  %v359_v9 = vmul.f32 %v3450_v54, %v334_v6  ;;  %v509_v55 = vmul.f32 %v3487_v11, %v493_v51 }
  0xc0   : > { %v817_v6 = vld [vmem:[%s4086_s4 + $0x30] sm:$0xff] }
  0xc1   : > { %v412_v58 = vadd.f32 %v404_v52, %v360_v57  ;;  %v3026_v52 = vld [vmem:[%s4085_s3] sm:$0xff]  }
  0xc2   : > { %v349_v26 = vpop.permute.xlu0 %348  ;;  %2840 = vmatprep.mubr.msk.bf16.mxu0 %vm947_vm0, %v3026_v52 }
  0xc3   : > { %3018 = vset.pattern.permute.xlu1 %v3119_v14  ;;  %v381_v60 = vpop.permute.xlu1 %380  ;;  %v3458_v61 = vadd.f32 %v456_v56, %v412_v58  ;;  %v507_v14 = vmul.f32 %v3487_v11, %v485_v44  ;;  %v3530_v58 = vsub.s32 4, %v3415_v42 }
  0xc4   : > { %600 = vperm.xlu1 %3018, %v3296_v12  }
  0xc5   : > { %v3540_v51 = vrot.slane %v3427_v46, %v3530_v58 }
  0xc6   : > { %v3527_v56 = vpop.permute.xlu0 %737 }
  0xc8   : > { %3019 = vset.pattern.permute.xlu1 %v3121_v16  ;;  %v3464_v63 = vpop.permute.xlu1 %476 }
  0xc9   : > { %692 = vperm.xlu1 %3019, %v3275_v10   ;;  %v403_v10 = vmul.f32 %v3440_v50, %v381_v60 }
  0xcb   : > { %v411_v17 = vadd.f32 %v403_v10, %v359_v9  ;;  %v541_v9 = vpop.permute.xlu0 %540 }
  0xcc   : > { %v3470_v1 = vpop.permute.xlu1 %480 }
  0xcd   : > { %3020 = vset.pattern.permute.xlu1 %v3116_v7 }
  0xce   : > { %747 = vperm.xlu1 %3020, %v729_v0  }
  0xd1   : > { %v3481_v5 = vpop.permute.xlu1 %576 }
  0xd2   : > { %752 = vperm.xlu1 %3020, %v730_v3  }
  0xd6   : > { %3022 = vset.pattern.permute.xlu1 %v3120_v15  ;;  %v433_v13 = vpop.permute.xlu1 %432  ;;  %v731_v15 = vld [vmem:[%s4084_s2 + $0x20] sm:$0xff] }
  0xd7   : > { %v455_v18 = vmul.f32 %v3446_v53, %v433_v13  ;;  %652 = vperm.xlu1 %3022, %v3296_v12   ;;  %v732_v12 = vld [vmem:[%s4084_s2 + $0x28] sm:$0xff]  ;;  %v560_v13 = vmul.f32 %v3540_v51, %v541_v9 }
  0xd9   : > { %v463_v19 = vadd.f32 %v455_v18, %v411_v17  ;;  %v819_v18 = vld [vmem:[%s4086_s4 + $0x40] sm:$0xff] }
  0xdb   : > { %3023 = vset.pattern.permute.xlu1 %v3121_v16  ;;  %v3494_v20 = vpop.permute.xlu1 %528  ;;  %v3496_v21 = vadd.f32 %v507_v14, %v463_v19 }
  0xdc   : > { %700 = vperm.xlu1 %3023, %v3264_v8   ;;  %v734_v8 = vld [vmem:[%s4084_s2 + $0x38] sm:$0xff] }
  0xdf   : > { %v3502_v22 = vpop.permute.xlu1 %532 }
  0xe0   : > { %3024 = vset.pattern.permute.xlu1 %v3116_v7 }
  0xe1   : > { %757 = vperm.xlu1 %3024, %v731_v15  }
  0xe4   : > { %v3508_v16 = vpop.permute.xlu1 %628 }
  0xe5   : > { %762 = vperm.xlu1 %3024, %v732_v12   ;;  %v821_v12 = vld [vmem:[%s4086_s4 + $0x50] sm:$0xff] }
  0xe9   : > { %772 = vperm.xlu1 %3024, %v734_v8   ;;  %v344_v23 = vpop.permute.xlu1 %343 }
  0xea   : > { %v361_v38 = vmul.f32 %v3450_v54, %v344_v23  ;;  %v823_v23 = vld [vmem:[%s4086_s4 + $0x60] sm:$0xff] }
  0xed   : > { %829 = vperm.xlu1 %3024, %v811_v25  }
  0xee   : > { %v389_v7 = vpop.permute.xlu1 %388 }
  0xef   : > { %v405_v44 = vmul.f32 %v3440_v50, %v389_v7  ;;  %v825_v7 = vld [vmem:[%s4086_s4 + $0x70] sm:$0xff] }
  0xf1   : > { %v413_v57 = vadd.f32 %v405_v44, %v361_v38  ;;  %839 = vperm.xlu1 %3024, %v813_v28   ;;  %v362_v28 = vmul.f32 %v3450_v54, %v349_v26  ;;  %v355_v26 = vmul.f32 %v3450_v54, %v3455_v59 }
  0xf2   : > { %v393_v60 = vpop.permute.xlu1 %392 }
  0xf3   : > { %v465_v0 = vadd.f32 %v457_v34, %v413_v57  ;;  %v406_v34 = vmul.f32 %v3440_v50, %v393_v60 }
  0xf5   : > { %849 = vperm.xlu1 %3024, %v815_v36   ;;  %v3536_v3 = vadd.f32 %v509_v55, %v465_v0  ;;  %v414_v52 = vadd.f32 %v406_v34, %v362_v28  ;;  %v3597_v34 = vsub.s32 6, %v3415_v42 }
  0xf7   : > { %v489_v10 = vpop.permute.xlu1 %488 }
  0xf8   : > { %v508_v14 = vmul.f32 %v3487_v11, %v489_v10 }
  0xf9   : > { %859 = vperm.xlu1 %3024, %v817_v6  }
  0xfa   : > { %v516_v17 = vadd.f32 %v508_v14, %v3458_v61  ;;  %v549_v61 = vpop.permute.xlu0 %548 }
  0xfc   : > { %v3551_v19 = vadd.f32 %v560_v13, %v516_v17  ;;  %v3553_v15 = vpop.permute.xlu1 %580  ;;  %v399_v13 = vmul.f32 %v3440_v50, %v3367_v24  ;;  %v451_v17 = vmul.f32 %v3446_v53, %v3380_v29  ;;  %v503_v24 = vmul.f32 %v3487_v11, %v3409_v40 }
  0xfd   : > { %869 = vperm.xlu1 %3024, %v819_v18  }
  0xfe   : > { %v573_v38 = vpop.permute.xlu0 %572  ;;  %v407_v18 = vadd.f32 %v399_v13, %v355_v26  ;;  %v3612_v26 = vrot.slane %v3427_v46, %v3597_v34 }
 0x101   : > { %879 = vperm.xlu1 %3024, %v821_v12   ;;  %v677_v8 = vpop.permute.xlu1 %676  ;;  %v400_v12 = vmul.f32 %v3440_v50, %v3373_v27  ;;  %v452_v27 = vmul.f32 %v3446_v53, %v3382_v30  ;;  %v504_v30 = vmul.f32 %v3487_v11, %v3402_v37 }
 0x102   : > { %v3567_v0 = vpop.permute.xlu0 %584 }
 0x105   : > { %889 = vperm.xlu1 %3024, %v823_v23   ;;  %v681_v25 = vpop.permute.xlu1 %680  ;;  %v3590_v23 = vsub.s32 5, %v3415_v42 }
 0x106   : > { %v3577_v60 = vpop.permute.xlu0 %592 }
 0x107   : > { %v3608_v40 = vrot.slane %v3427_v46, %v3590_v23 }
 0x109   : > { %899 = vperm.xlu1 %3024, %v825_v7   ;;  %v459_v7 = vadd.f32 %v451_v17, %v407_v18  ;;  %v607_v18 = vmul.f32 %v3608_v40, %v573_v38  ;;  %v660_v38 = vmul.f32 %v3612_v26, %v3508_v16  ;;  %v358_v16 = vmul.f32 %v3450_v54, %v3473_v2 }
 0x10a   : > { %v445_v44 = vpop.permute.xlu1 %444  ;;  %v3592_v59 = vpop.permute.xlu0 %596  ;;  %v505_v2 = vmul.f32 %v3487_v11, %v3464_v63 }
 0x10b   : > { %v458_v55 = vmul.f32 %v3446_v53, %v445_v44  ;;  %v562_v44 = vmul.f32 %v3540_v51, %v549_v61 }
 0x10d   : > { %v466_v57 = vadd.f32 %v458_v55, %v414_v52  ;;  %v3604_v52 = vsub.s32 7, %v3415_v42 }
 0x10e   : > { %v625_v61 = vpop.permute.xlu0 %624 }
 0x10f   : > { %v537_v36 = vpop.permute.xlu1 %536 }
 0x110   : > { %v559_v6 = vmul.f32 %v3540_v51, %v537_v36  ;;  %v511_v36 = vadd.f32 %v503_v24, %v459_v7  ;;  %v659_v7 = vmul.f32 %v3612_v26, %v625_v61 }
 0x112   : > { %v3571_v9 = vadd.f32 %v559_v6, %v3496_v21  ;;  %v356_v21 = vmul.f32 %v3450_v54, %v3461_v62 }
 0x114   : > { %v3573_v10 = vpop.permute.xlu1 %632  ;;  %v408_v28 = vadd.f32 %v400_v12, %v356_v21  ;;  %v3625_v21 = vrot.slane %v3427_v46, %v3604_v52 }
 0x116   : > { %v460_v6 = vadd.f32 %v452_v27, %v408_v28  ;;  %v556_v28 = vmul.f32 %v3540_v51, %v3435_v49 }
 0x118   : > { %v3581_v14 = vpop.permute.xlu1 %636  ;;  %v512_v24 = vadd.f32 %v504_v30, %v460_v6 }
 0x11d   : > { %v497_v29 = vpop.permute.xlu1 %496 }
 0x11e   : > { %v510_v62 = vmul.f32 %v3487_v11, %v497_v29  ;;  %v608_v29 = vmul.f32 %v3608_v40, %v3481_v5 }
 0x120   : > { %v518_v55 = vadd.f32 %v510_v62, %v466_v57  ;;  %v555_v57 = vmul.f32 %v3540_v51, %v3421_v43  ;;  %v564_v62 = vadd.f32 %v556_v28, %v512_v24 }
 0x122   : > { %v3614_v13 = vpop.permute.xlu1 %588  ;;  %v3616_v17 = vadd.f32 %v562_v44, %v518_v55  ;;  %v563_v12 = vadd.f32 %v555_v57, %v511_v36  ;;  %v711_v44 = vmul.f32 %v3625_v21, %v677_v8  ;;  %v616_v27 = vadd.f32 %v608_v29, %v564_v62 }
 0x123   : > { %v712_v36 = vmul.f32 %v3625_v21, %v681_v25  ;;  %v401_v25 = vmul.f32 %v3440_v50, %v3392_v33  ;;  %v357_v29 = vmul.f32 %v3450_v54, %v3386_v31  ;;  %v506_v33 = vmul.f32 %v3487_v11, %v3470_v1 }
 0x124   : > { %v615_v37 = vadd.f32 %v607_v18, %v563_v12  ;;  %v668_v61 = vadd.f32 %v660_v38, %v616_v27  ;;  %v558_v31 = vmul.f32 %v3540_v51, %v3502_v22  ;;  %v661_v1 = vmul.f32 %v3612_v26, %v3573_v10 }
 0x126   : > { %v667_v46 = vadd.f32 %v659_v7, %v615_v37  ;;  %v720_v30 = vadd.f32 %v712_v36, %v668_v61  ;;  %v402_v7 = vmul.f32 %v3440_v50, %v3395_v35 }
 0x127   : > { %v685_v43 = vpop.permute.xlu1 %684 }
 0x128   : > { %v719_v55 = vadd.f32 %v711_v44, %v667_v46  ;;  %v410_v37 = vadd.f32 %v402_v7, %v358_v16  ;;  %v409_v44 = vadd.f32 %v401_v25, %v357_v29  ;;  %v713_v22 = vmul.f32 %v3625_v21, %v685_v43  ;;  %v649_v25 = vpop.permute.xlu0 %648 }
 0x129   : > { %v612_v43 = vmul.f32 %v3608_v40, %v3577_v60 }
 0x12a   : > { %v775_v49 = vadd.f32 %v3527_v56, %v719_v55  ;;  %v454_v56 = vmul.f32 %v3446_v53, %v3388_v32  ;;  %v557_v32 = vmul.f32 %v3540_v51, %v3494_v20  ;;  %v662_v20 = vmul.f32 %v3612_v26, %v3581_v14 }
 0x12b   : > { %v689_v6 = vpop.permute.xlu1 %688  ;;  %v620_v60 = vadd.f32 %v612_v43, %v3551_v19 }
 0x12c   : > { %v783_v12 = vmax.f32 %v775_v49, 0.0  ;;  %v462_v50 = vadd.f32 %v454_v56, %v410_v37  ;;  %v714_v61 = vmul.f32 %v3625_v21, %v689_v6  ;;  %v613_v6 = vmul.f32 %v3608_v40, %v3592_v59 }
 0x12d   : > { %v611_v56 = vmul.f32 %v3608_v40, %v3614_v13 }
 0x12e   : > { %v514_v38 = vadd.f32 %v506_v33, %v462_v50 }
 0x130   : > { %v743_v57 = vpop.permute.xlu1 %742  ;;  %v566_v46 = vadd.f32 %v558_v31, %v514_v38 }
 0x131   : > { %v776_v5 = vadd.f32 %v743_v57, %v720_v30 }
 0x133   : > { %v784_v18 = vmax.f32 %v776_v5, 0.0 }
 0x135   : > { %v545_v8 = vpop.permute.xlu1 %544  ;;  %v791_v39 = vpack.c.bf16 %v784_v18, %v783_v12 }
 0x136   : > { %v561_v16 = vmul.f32 %v3540_v51, %v545_v8 }
 0x137   : > { %2832 = vmatprep.subr.bf16.mxu0 %v791_v39 }
 0x138   : > { %2833 = vmatpush3.bf16.msra.mxu0 %v791_v39  ;;  %v453_v39 = vmul.f32 %v3446_v53, %v3412_v41  ;;  %v609_v41 = vmul.f32 %v3608_v40, %v3553_v15  ;;  %v610_v53 = vmul.f32 %v3608_v40, %v3567_v0  ;;  %v569_v29 = vadd.f32 %v561_v16, %v3536_v3 }
 0x13a   : > { %v641_v24 = vpop.permute.xlu1 %640  ;;  %v461_v35 = vadd.f32 %v453_v39, %v409_v44  ;;  %v618_v36 = vadd.f32 %v610_v53, %v566_v46  ;;  %v697_v39 = vpop.permute.xlu0 %696  ;;  %v665_v44 = vmul.f32 %v3612_v26, %v649_v25  ;;  %v621_v33 = vadd.f32 %v613_v6, %v569_v29 }
 0x13b   : > { %v663_v37 = vmul.f32 %v3612_v26, %v641_v24  ;;  %v716_v3 = vmul.f32 %v3625_v21, %v697_v39 }
 0x13c   : > { %v513_v54 = vadd.f32 %v505_v2, %v461_v35  ;;  %v670_v30 = vadd.f32 %v662_v20, %v618_v36  ;;  %v619_v2 = vadd.f32 %v611_v56, %v3571_v9 }
 0x13e   : > { %v645_v28 = vpop.permute.xlu1 %644  ;;  %v565_v63 = vadd.f32 %v557_v32, %v513_v54  ;;  %v722_v57 = vadd.f32 %v714_v61, %v670_v30  ;;  %v671_v35 = vadd.f32 %v663_v37, %v619_v2  ;;  %v705_v32 = vpop.permute.xlu0 %704  ;;  %v673_v54 = vadd.f32 %v665_v44, %v621_v33  ;;  %v3028_v30 = vld [vmem:[%s4085_s3 + $0x10] sm:$0xff]  }
 0x13f   : > { %v664_v51 = vmul.f32 %v3612_v26, %v645_v28  ;;  %v718_v9 = vmul.f32 %v3625_v21, %v705_v32 }
 0x140   : > { %v617_v27 = vadd.f32 %v609_v41, %v565_v63 }
 0x141   : > { %v672_v50 = vadd.f32 %v664_v51, %v620_v60 }
 0x142   : > { %v669_v55 = vadd.f32 %v661_v1, %v617_v27  ;;  %v768_v1 = vpop.permute.xlu0 %767 }
 0x143   : > { %v601_v62 = vpop.permute.xlu1 %600  ;;  %v724_v53 = vadd.f32 %v716_v3, %v672_v50 }
 0x144   : > { %v721_v49 = vadd.f32 %v713_v22, %v669_v55  ;;  %v614_v59 = vmul.f32 %v3608_v40, %v601_v62 }
 0x146   : > { %v622_v19 = vadd.f32 %v614_v59, %v3616_v17 }
 0x148   : > { %v693_v11 = vpop.permute.xlu1 %692 }
 0x149   : > { %v715_v13 = vmul.f32 %v3625_v21, %v693_v11 }
 0x14b   : > { %v723_v38 = vadd.f32 %v715_v13, %v671_v35 }
 0x14d   : > { %v748_v15 = vpop.permute.xlu1 %747 }
 0x14e   : > { %v777_v0 = vadd.f32 %v748_v15, %v721_v49  ;;  %v3029_v49 = vld [vmem:[%s4085_s3 + $0x18] sm:$0xff]  }
 0x150   : > { %v785_v12 = vmax.f32 %v777_v0, 0.0  ;;  %v3030_v0 = vld [vmem:[%s4085_s3 + $0x20] sm:$0xff]  }
 0x151   : > { %v753_v5 = vpop.permute.xlu1 %752 }
 0x152   : > { %v778_v18 = vadd.f32 %v753_v5, %v722_v57  ;;  %v3031_v57 = vld [vmem:[%s4085_s3 + $0x28] sm:$0xff]   ;;  %v3032_v5 = vld [vmem:[%s4085_s3 + $0x30] sm:$0xff]  }
 0x154   : > { %v786_v10 = vmax.f32 %v778_v18, 0.0  ;;  %v3033_v18 = vld [vmem:[%s4085_s3 + $0x38] sm:$0xff]  }
 0x156   : > { %v792_v7 = vpack.c.bf16 %v786_v10, %v785_v12  ;;  %v653_v14 = vpop.permute.xlu1 %652  ;;  %v835_v10 = vpop.permute.xlu0 %834 }
 0x157   : > { %v666_v24 = vmul.f32 %v3612_v26, %v653_v14 }
 0x158   : > { %2834 = vmatprep.subr.bf16.mxu0 %v792_v7 }
 0x159   : > { %2835 = vmatpush3.bf16.msra.mxu0 %v792_v7  ;;  %v674_v41 = vadd.f32 %v666_v24, %v622_v19 }
 0x15a   : > { %v845_v25 = vpop.permute.xlu0 %844 }
 0x15b   : > { %v701_v8 = vpop.permute.xlu1 %700  ;;  %v726_v20 = vadd.f32 %v718_v9, %v674_v41 }
 0x15c   : > { %v717_v28 = vmul.f32 %v3625_v21, %v701_v8  ;;  %v3027_v21 = vld [vmem:[%s4085_s3 + $0x8] sm:$0xff]  }
 0x15e   : > { %v725_v40 = vadd.f32 %v717_v28, %v673_v54  ;;  %v855_v14 = vpop.permute.xlu0 %854 }
 0x160   : > { %v758_v31 = vpop.permute.xlu1 %757  ;;  %v781_v11 = vadd.f32 %v768_v1, %v725_v40 }
 0x161   : > { %v779_v62 = vadd.f32 %v758_v31, %v723_v38 }
 0x162   : > { %v789_v61 = vmax.f32 %v781_v11, 0.0  ;;  %v865_v33 = vpop.permute.xlu0 %864 }
 0x163   : > { %v787_v27 = vmax.f32 %v779_v62, 0.0 }
 0x164   : > { %v763_v63 = vpop.permute.xlu1 %762 }
 0x165   : > { %v780_v46 = vadd.f32 %v763_v63, %v724_v53 }
 0x166   : > { %v875_v32 = vpop.permute.xlu0 %874 }
 0x167   : > { %v788_v26 = vmax.f32 %v780_v46, 0.0 }
 0x168   : > { %v773_v22 = vpop.permute.xlu1 %772 }
 0x169   : > { %v793_v55 = vpack.c.bf16 %v788_v26, %v787_v27  ;;  %v782_v36 = vadd.f32 %v773_v22, %v726_v20 }
 0x16a   : > { %v885_v63 = vpop.permute.xlu0 %884 }
 0x16b   : > { %v790_v15 = vmax.f32 %v782_v36, 0.0  ;;  %2836 = vmatprep.subr.bf16.mxu0 %v793_v55 }
 0x16c   : > { %2837 = vmatpush3.bf16.msra.mxu0 %v793_v55  ;;  %v830_v12 = vpop.permute.xlu1 %829 }
 0x16d   : > { %v794_v17 = vpack.c.bf16 %v790_v15, %v789_v61 }
 0x16f   : > { %2838 = vmatprep.subr.bf16.mxu0 %v794_v17 }
 0x170   : > { %2839 = vmatpush3.bf16.msra.mxu0 %v794_v17  ;;  %v840_v16 = vpop.permute.xlu1 %839  ;;  %v895_v17 = vpop.permute.xlu0 %894 }
 0x173   : > { %2841 = vmatmul.mubr.msk.bf16.vlgmr.msra.gmra.mrb[0].mxu0 %vm947_vm0, %v3027_v21 }
 0x174   : > { %2844 = vmatprep.mubr.msk.bf16.mxu0 %vm947_vm0, %v3028_v30  ;;  %v850_v7 = vpop.permute.xlu1 %849 }
 0x178   : > { %v860_v37 = vpop.permute.xlu1 %859 }
 0x17b   : > { %2845 = vmatmul.mubr.msk.bf16.gmra.mrb[4].mxu0 %vm947_vm0, %v3029_v49 }
 0x17c   : > { %2848 = vmatprep.mubr.msk.bf16.mxu0 %vm947_vm0, %v3030_v0  ;;  %v870_v35 = vpop.permute.xlu1 %869 }
 0x180   : > { %v880_v40 = vpop.permute.xlu1 %879 }
 0x183   : > { %2849 = vmatmul.mubr.msk.bf16.gmra.mrb[8].mxu0 %vm947_vm0, %v3031_v57 }
 0x184   : > { %2852 = vmatprep.mubr.msk.bf16.mxu0 %vm947_vm0, %v3032_v5  ;;  %v890_v36 = vpop.permute.xlu1 %889 }
 0x18b   : > { %2853 = vmatmul.mubr.msk.bf16.gmra.mrb[12].mxu0 %vm947_vm0, %v3033_v18  ;;  %v900_v18 = vpop.permute.xlu1 %899  ;;  %vm2587_vm0 = vcmask 1048512  }
 0x246   : > { %v2842_v43 = vpop.f32.mrb[0].mxu0 }
 0x247   : > { %v1015_v6 = vadd.f32 %v2842_v43, %v840_v16  ;;  %v1006_v56 = vpop.f32.mrb[1].mxu0 }
 0x248   : > { %v1007_v29 = vadd.f32 %v1006_v56, %v830_v12  ;;  %v2843_v39 = vpop.f32.mrb[2].mxu0 }
 0x249   : > { %v1071_v51 = vmax.f32 %v1015_v6, 0.0  ;;  %v1009_v8 = vpop.f32.mrb[3].mxu0  ;;  %v1018_v60 = vadd.f32 %v2843_v39, %v845_v25 }
 0x24a   : > { %v1069_v44 = vmax.f32 %v1007_v29, 0.0  ;;  %v1010_v2 = vadd.f32 %v1009_v8, %v835_v10  ;;  %v3122_v29 = vmov 1966171168  }
 0x24b   : > { %1090 = vmax.xlane.f32.xlu0 %v1071_v51  ;;  %v1072_v13 = vmax.f32 %v1018_v60, 0.0  ;;  %v1651_v39 = vunpack.c.l.s4 %v3122_v29 }
 0x24c   : > { %v1070_v59 = vmax.f32 %v1010_v2, 0.0  ;;  %1086 = vmax.xlane.f32.xlu1 %v1069_v44 }
 0x24e   : > { %v2846_v3 = vpop.f32.mrb[4].mxu0 }
 0x24f   : > { %v1031_v50 = vadd.f32 %v2846_v3, %v860_v37  ;;  %v1022_v24 = vpop.f32.mrb[5].mxu0  ;;  %1088 = vmax.xlane.f32.xlu0 %v1070_v59  ;;  %v1652_v37 = vunpack.c.0.s8 %v1651_v39 }
 0x250   : > { %v2847_v28 = vpop.f32.mrb[6].mxu0  ;;  %1092 = vmax.xlane.f32.xlu1 %v1072_v13  ;;  %v1023_v54 = vadd.f32 %v1022_v24, %v850_v7  ;;  %v905_v7 = vpop.permute.xlu0 %904 }
 0x251   : > { %v1075_v31 = vmax.f32 %v1031_v50, 0.0  ;;  %v1034_v19 = vadd.f32 %v2847_v28, %v865_v33  ;;  %v1025_v38 = vpop.f32.mrb[7].mxu0  ;;  %v3716_v8 = vsub.s32 %v1652_v37, %v3415_v42 }
 0x252   : > { %v1026_v41 = vadd.f32 %v1025_v38, %v855_v14  ;;  %v1073_v62 = vmax.f32 %v1023_v54, 0.0 }
 0x253   : > { %v1076_v9 = vmax.f32 %v1034_v19, 0.0  ;;  %1098 = vmax.xlane.f32.xlu0 %v1075_v31 }
 0x254   : > { %v1074_v46 = vmax.f32 %v1026_v41, 0.0 }
 0x255   : > { %1100 = vmax.xlane.f32.xlu1 %v1076_v9 }
 0x256   : > { %v2850_v53 = vpop.f32.mrb[8].mxu0 }
 0x257   : > { %v1047_v1 = vadd.f32 %v2850_v53, %v880_v40  ;;  %v1038_v11 = vpop.f32.mrb[9].mxu0  ;;  %1094 = vmax.xlane.f32.xlu0 %v1073_v62 }
 0x258   : > { %v2851_v27 = vpop.f32.mrb[10].mxu0  ;;  %v1039_v20 = vadd.f32 %v1038_v11, %v870_v35 }
 0x259   : > { %v1079_v26 = vmax.f32 %v1047_v1, 0.0  ;;  %v1050_v22 = vadd.f32 %v2851_v27, %v885_v63  ;;  %v1041_v55 = vpop.f32.mrb[11].mxu0  ;;  %1096 = vmax.xlane.f32.xlu1 %v1074_v46 }
 0x25a   : > { %v1042_v15 = vadd.f32 %v1041_v55, %v875_v32  ;;  %v1077_v21 = vmax.f32 %v1039_v20, 0.0 }
 0x25b   : > { %v1080_v61 = vmax.f32 %v1050_v22, 0.0  ;;  %1106 = vmax.xlane.f32.xlu0 %v1079_v26 }
 0x25c   : > { %v1078_v49 = vmax.f32 %v1042_v15, 0.0 }
 0x25d   : > { %1108 = vmax.xlane.f32.xlu1 %v1080_v61 }
 0x25e   : > { %v2854_v30 = vpop.f32.mrb[12].mxu0 }
 0x25f   : > { %v1054_v0 = vpop.f32.mrb[13].mxu0  ;;  %1102 = vmax.xlane.f32.xlu0 %v1077_v21  ;;  %v1063_v10 = vadd.f32 %v2854_v30, %v900_v18 }
 0x260   : > { %v1055_v57 = vadd.f32 %v1054_v0, %v890_v36  ;;  %v2855_v5 = vpop.f32.mrb[14].mxu0 }
 0x261   : > { %v1057_v12 = vpop.f32.mrb[15].mxu0  ;;  %1104 = vmax.xlane.f32.xlu1 %v1078_v49  ;;  %v1066_v14 = vadd.f32 %v2855_v5, %v905_v7  ;;  %v1083_v6 = vmax.f32 %v1063_v10, 0.0 }
 0x262   : > { %v1081_v16 = vmax.f32 %v1055_v57, 0.0  ;;  %v1058_v25 = vadd.f32 %v1057_v12, %v895_v17 }
 0x263   : > { %v1084_v56 = vmax.f32 %v1066_v14, 0.0 }
 0x264   : > { %v1082_v43 = vmax.f32 %v1058_v25, 0.0  ;;  %1110 = vmax.xlane.f32.xlu0 %v1081_v16 }
 0x266   : > { %1112 = vmax.xlane.f32.xlu1 %v1082_v43 }
 0x268   : > { %1114 = vmax.xlane.f32.xlu0 %v1083_v6 }
 0x26a   : > { %1116 = vmax.xlane.f32.xlu1 %v1084_v56 }
 0x2d8   : > { %v1091_v51 = vpop.xlane.xlu0 %1090 }
 0x2d9   : > { %v1087_v44 = vpop.xlane.xlu1 %1086  ;;  %v1201_v60 = vrot.slane %v1091_v51, %v3433_v48  ;;  %v1205_v2 = vrot.slane %v1091_v51, %v3425_v45  ;;  %v1209_v33 = vrot.slane %v1091_v51, %v3430_v47  ;;  %v1213_v59 = vrot.slane %v1091_v51, %v3479_v4 }
 0x2da   : > { %v1217_v13 = vrot.slane %v1091_v51, %v3530_v58  ;;  %v1221_v3 = vrot.slane %v1091_v51, %v3590_v23  ;;  %v1225_v35 = vrot.slane %v1091_v51, %v3597_v34  ;;  %v1229_v50 = vrot.slane %v1091_v51, %v3604_v52 }
 0x2db   : > { %v1744_v24 = vcombine.low %v1201_v60, %v1205_v2  ;;  %v1745_v28 = vcombine.low %v1209_v33, %v1213_v59  ;;  %v1137_v32 = vrot.slane %v1087_v44, %v3433_v48  ;;  %v1141_v31 = vrot.slane %v1087_v44, %v3425_v45 }
 0x2dc   : > { %v1746_v54 = vcombine.low %v1217_v13, %v1221_v3  ;;  %v1747_v19 = vcombine.low %v1225_v35, %v1229_v50  ;;  %v1145_v38 = vrot.slane %v1087_v44, %v3430_v47  ;;  %v1149_v9 = vrot.slane %v1087_v44, %v3479_v4  ;;  %v1089_v41 = vpop.xlane.xlu0 %1088 }
 0x2dd   : > { %v1754_v40 = vrot.slane %v1744_v24, %v3716_v8  ;;  %v1761_v62 = vrot.slane %v1745_v28, %v3716_v8  ;;  %v1153_v53 = vrot.slane %v1087_v44, %v3530_v58  ;;  %v1157_v63 = vrot.slane %v1087_v44, %v3590_v23  ;;  %v1093_v57 = vpop.xlane.xlu1 %1092 }
 0x2de   : > { %v1768_v46 = vrot.slane %v1746_v54, %v3716_v8  ;;  %v1775_v1 = vrot.slane %v1747_v19, %v3716_v8  ;;  %v1161_v11 = vrot.slane %v1087_v44, %v3597_v34  ;;  %v1165_v27 = vrot.slane %v1087_v44, %v3604_v52 }
 0x2df   : > { %v1776_v26 = vcombine.low %v1754_v40, %v1761_v62  ;;  %v1646_v20 = vcombine.low %v1137_v32, %v1141_v31  ;;  %v1647_v22 = vcombine.low %v1145_v38, %v1149_v9  ;;  %v1648_v55 = vcombine.low %v1153_v53, %v1157_v63 }
 0x2e0   : > { %v1777_v36 = vcombine.low %v1768_v46, %v1775_v1  ;;  %v1649_v61 = vcombine.low %v1161_v11, %v1165_v27  ;;  %v1169_v15 = vrot.slane %v1089_v41, %v3433_v48  ;;  %v1173_v17 = vrot.slane %v1089_v41, %v3425_v45  ;;  %v1099_v13 = vpop.xlane.xlu0 %1098 }
 0x2e1   : > { %v1784_v21 = vrot.slane %v1776_v26, %v3716_v8  ;;  %v1656_v30 = vrot.slane %v1646_v20, %v3716_v8  ;;  %v1663_v49 = vrot.slane %v1647_v22, %v3716_v8  ;;  %v1670_v0 = vrot.slane %v1648_v55, %v3716_v8 }
 0x2e2   : > { %v1791_v5 = vrot.slane %v1777_v36, %v3716_v8  ;;  %v1677_v18 = vrot.slane %v1649_v61, %v3716_v8  ;;  %v1177_v12 = vrot.slane %v1089_v41, %v3430_v47  ;;  %v1181_v10 = vrot.slane %v1089_v41, %v3479_v4  ;;  %v1101_v36 = vpop.xlane.xlu1 %1100 }
 0x2e3   : > { %v1678_v16 = vcombine.low %v1656_v30, %v1663_v49  ;;  %v1185_v25 = vrot.slane %v1089_v41, %v3530_v58  ;;  %v1189_v7 = vrot.slane %v1089_v41, %v3590_v23  ;;  %v1193_v14 = vrot.slane %v1089_v41, %v3597_v34 }
 0x2e4   : > { %v1792_v43 = vcombine.low %v1784_v21, %v1791_v5  ;;  %v1679_v6 = vcombine.low %v1670_v0, %v1677_v18  ;;  %v1197_v56 = vrot.slane %v1089_v41, %v3604_v52  ;;  %v1695_v29 = vcombine.low %v1169_v15, %v1173_v17 }
 0x2e5   : > { %v1686_v39 = vrot.slane %v1678_v16, %v3716_v8  ;;  %v1696_v37 = vcombine.low %v1177_v12, %v1181_v10  ;;  %v1697_v51 = vcombine.low %v1185_v25, %v1189_v7  ;;  %v1233_v44 = vrot.slane %v1093_v57, %v3433_v48 }
 0x2e6   : > { %2437 = vperm.xlu1 %3024, %v1792_v43   ;;  %v1693_v60 = vrot.slane %v1679_v6, %v3716_v8  ;;  %v1698_v2 = vcombine.low %v1193_v14, %v1197_v56  ;;  %v1705_v33 = vrot.slane %v1695_v29, %v3716_v8  ;;  %v1237_v59 = vrot.slane %v1093_v57, %v3425_v45 }
 0x2e7   : > { %v1712_v3 = vrot.slane %v1696_v37, %v3716_v8  ;;  %v1719_v35 = vrot.slane %v1697_v51, %v3716_v8  ;;  %v1241_v50 = vrot.slane %v1093_v57, %v3430_v47  ;;  %v1245_v24 = vrot.slane %v1093_v57, %v3479_v4 }
 0x2e8   : > { %v1694_v28 = vcombine.low %v1686_v39, %v1693_v60  ;;  %v1726_v32 = vrot.slane %v1698_v2, %v3716_v8  ;;  %v1249_v31 = vrot.slane %v1093_v57, %v3530_v58  ;;  %v1253_v54 = vrot.slane %v1093_v57, %v3590_v23  ;;  %v1095_v39 = vpop.xlane.xlu0 %1094 }
 0x2e9   : > { %v1727_v19 = vcombine.low %v1705_v33, %v1712_v3  ;;  %v1257_v38 = vrot.slane %v1093_v57, %v3597_v34  ;;  %v1261_v9 = vrot.slane %v1093_v57, %v3604_v52  ;;  %v1793_v41 = vcombine.low %v1233_v44, %v1237_v59 }
 0x2ea   : > { %2431 = vperm.xlu0 %3025, %v1694_v28   ;;  %v1728_v40 = vcombine.low %v1719_v35, %v1726_v32  ;;  %v1794_v62 = vcombine.low %v1241_v50, %v1245_v24  ;;  %v1795_v53 = vcombine.low %v1249_v31, %v1253_v54  ;;  %v1329_v63 = vrot.slane %v1099_v13, %v3433_v48 }
 0x2eb   : > { %v1735_v46 = vrot.slane %v1727_v19, %v3716_v8  ;;  %v1796_v1 = vcombine.low %v1257_v38, %v1261_v9  ;;  %v1803_v11 = vrot.slane %v1793_v41, %v3716_v8  ;;  %v1333_v27 = vrot.slane %v1099_v13, %v3425_v45 }
 0x2ec   : > { %v1742_v26 = vrot.slane %v1728_v40, %v3716_v8  ;;  %v1810_v20 = vrot.slane %v1794_v62, %v3716_v8  ;;  %v1817_v22 = vrot.slane %v1795_v53, %v3716_v8  ;;  %v1337_v55 = vrot.slane %v1099_v13, %v3430_v47  ;;  %v1097_v40 = vpop.xlane.xlu1 %1096 }
 0x2ed   : > { %v1824_v61 = vrot.slane %v1796_v1, %v3716_v8  ;;  %v1341_v15 = vrot.slane %v1099_v13, %v3479_v4  ;;  %v1345_v17 = vrot.slane %v1099_v13, %v3530_v58  ;;  %v1349_v21 = vrot.slane %v1099_v13, %v3590_v23 }
 0x2ee   : > { %v1743_v30 = vcombine.low %v1735_v46, %v1742_v26  ;;  %v1825_v49 = vcombine.low %v1803_v11, %v1810_v20  ;;  %v1353_v0 = vrot.slane %v1099_v13, %v3597_v34  ;;  %v1357_v57 = vrot.slane %v1099_v13, %v3604_v52 }
 0x2ef   : > { %v1826_v5 = vcombine.low %v1817_v22, %v1824_v61  ;;  %v1940_v18 = vcombine.low %v1329_v63, %v1333_v27  ;;  %v1941_v12 = vcombine.low %v1337_v55, %v1341_v15  ;;  %v1942_v10 = vcombine.low %v1345_v17, %v1349_v21 }
 0x2f0   : > { %2434 = vperm.xlu1 %3024, %v1743_v30   ;;  %v1833_v16 = vrot.slane %v1825_v49, %v3716_v8  ;;  %v1943_v25 = vcombine.low %v1353_v0, %v1357_v57  ;;  %v1361_v7 = vrot.slane %v1101_v36, %v3433_v48  ;;  %v1365_v14 = vrot.slane %v1101_v36, %v3425_v45 }
 0x2f1   : > { %v1840_v43 = vrot.slane %v1826_v5, %v3716_v8  ;;  %v1950_v6 = vrot.slane %v1940_v18, %v3716_v8  ;;  %v1957_v56 = vrot.slane %v1941_v12, %v3716_v8  ;;  %v1964_v29 = vrot.slane %v1942_v10, %v3716_v8 }
 0x2f2   : > { %v1971_v37 = vrot.slane %v1943_v25, %v3716_v8  ;;  %v1369_v51 = vrot.slane %v1101_v36, %v3430_v47  ;;  %v1373_v44 = vrot.slane %v1101_v36, %v3479_v4  ;;  %v1377_v60 = vrot.slane %v1101_v36, %v3530_v58 }
 0x2f3   : > { %v1841_v2 = vcombine.low %v1833_v16, %v1840_v43  ;;  %v1972_v33 = vcombine.low %v1950_v6, %v1957_v56  ;;  %v1381_v59 = vrot.slane %v1101_v36, %v3590_v23  ;;  %v1385_v13 = vrot.slane %v1101_v36, %v3597_v34  ;;  %v1107_v16 = vpop.xlane.xlu0 %1106 }
 0x2f4   : > { %v1973_v3 = vcombine.low %v1964_v29, %v1971_v37  ;;  %v1389_v35 = vrot.slane %v1101_v36, %v3604_v52  ;;  %v1989_v50 = vcombine.low %v1361_v7, %v1365_v14  ;;  %v1990_v24 = vcombine.low %v1369_v51, %v1373_v44 }
 0x2f5   : > { %2440 = vperm.xlu0 %3025, %v1841_v2   ;;  %v1980_v28 = vrot.slane %v1972_v33, %v3716_v8  ;;  %v1991_v32 = vcombine.low %v1377_v60, %v1381_v59  ;;  %v1265_v31 = vrot.slane %v1095_v39, %v3433_v48  ;;  %v1269_v54 = vrot.slane %v1095_v39, %v3425_v45 }
 0x2f6   : > { %v1987_v19 = vrot.slane %v1973_v3, %v3716_v8  ;;  %v1992_v38 = vcombine.low %v1385_v13, %v1389_v35  ;;  %v1999_v9 = vrot.slane %v1989_v50, %v3716_v8  ;;  %v2006_v41 = vrot.slane %v1990_v24, %v3716_v8 }
 0x2f7   : > { %v2013_v62 = vrot.slane %v1991_v32, %v3716_v8  ;;  %v1273_v53 = vrot.slane %v1095_v39, %v3430_v47  ;;  %v1277_v63 = vrot.slane %v1095_v39, %v3479_v4  ;;  %v1281_v46 = vrot.slane %v1095_v39, %v3530_v58 }
 0x2f8   : > { %v1988_v1 = vcombine.low %v1980_v28, %v1987_v19  ;;  %v2020_v11 = vrot.slane %v1992_v38, %v3716_v8  ;;  %v2021_v27 = vcombine.low %v1999_v9, %v2006_v41  ;;  %v1285_v26 = vrot.slane %v1095_v39, %v3590_v23  ;;  %v1109_v28 = vpop.xlane.xlu1 %1108 }
 0x2f9   : > { %v1289_v20 = vrot.slane %v1095_v39, %v3597_v34  ;;  %v1293_v22 = vrot.slane %v1095_v39, %v3604_v52  ;;  %v1842_v55 = vcombine.low %v1265_v31, %v1269_v54  ;;  %v1843_v36 = vcombine.low %v1273_v53, %v1277_v63 }
 0x2fa   : > { %2449 = vperm.xlu1 %3024, %v1988_v1   ;;  %v2022_v61 = vcombine.low %v2013_v62, %v2020_v11  ;;  %v2029_v15 = vrot.slane %v2021_v27, %v3716_v8  ;;  %v1844_v17 = vcombine.low %v1281_v46, %v1285_v26  ;;  %v1297_v21 = vrot.slane %v1097_v40, %v3433_v48 }
 0x2fb   : > { %v1845_v30 = vcombine.low %v1289_v20, %v1293_v22  ;;  %v1852_v49 = vrot.slane %v1842_v55, %v3716_v8  ;;  %v1859_v0 = vrot.slane %v1843_v36, %v3716_v8  ;;  %v1301_v57 = vrot.slane %v1097_v40, %v3425_v45 }
 0x2fc   : > { %v2036_v5 = vrot.slane %v2022_v61, %v3716_v8  ;;  %v1866_v18 = vrot.slane %v1844_v17, %v3716_v8  ;;  %v1305_v12 = vrot.slane %v1097_v40, %v3430_v47  ;;  %v1309_v10 = vrot.slane %v1097_v40, %v3479_v4  ;;  %v1103_v61 = vpop.xlane.xlu0 %1102 }
 0x2fd   : > { %v1873_v25 = vrot.slane %v1845_v30, %v3716_v8  ;;  %v1874_v7 = vcombine.low %v1852_v49, %v1859_v0  ;;  %v1313_v14 = vrot.slane %v1097_v40, %v3530_v58  ;;  %v1317_v43 = vrot.slane %v1097_v40, %v3590_v23 }
 0x2fe   : > { %v2037_v6 = vcombine.low %v2029_v15, %v2036_v5  ;;  %v1321_v56 = vrot.slane %v1097_v40, %v3597_v34  ;;  %v1325_v29 = vrot.slane %v1097_v40, %v3604_v52  ;;  %v1891_v39 = vcombine.low %v1297_v21, %v1301_v57 }
 0x2ff   : > { %v1875_v37 = vcombine.low %v1866_v18, %v1873_v25  ;;  %v1882_v51 = vrot.slane %v1874_v7, %v3716_v8  ;;  %v1892_v44 = vcombine.low %v1305_v12, %v1309_v10  ;;  %v1893_v60 = vcombine.low %v1313_v14, %v1317_v43 }
 0x300   : > { %2452 = vperm.xlu0 %3025, %v2037_v6   ;;  %v1894_v2 = vcombine.low %v1321_v56, %v1325_v29  ;;  %v1901_v33 = vrot.slane %v1891_v39, %v3716_v8  ;;  %v1457_v59 = vrot.slane %v1107_v16, %v3433_v48  ;;  %v1461_v13 = vrot.slane %v1107_v16, %v3425_v45 }
 0x301   : > { %v1889_v3 = vrot.slane %v1875_v37, %v3716_v8  ;;  %v1908_v35 = vrot.slane %v1892_v44, %v3716_v8  ;;  %v1915_v50 = vrot.slane %v1893_v60, %v3716_v8  ;;  %v1465_v24 = vrot.slane %v1107_v16, %v3430_v47  ;;  %v1105_v37 = vpop.xlane.xlu1 %1104 }
 0x302   : > { %v1922_v32 = vrot.slane %v1894_v2, %v3716_v8  ;;  %v1469_v31 = vrot.slane %v1107_v16, %v3479_v4  ;;  %v1473_v54 = vrot.slane %v1107_v16, %v3530_v58  ;;  %v1477_v19 = vrot.slane %v1107_v16, %v3590_v23 }
 0x303   : > { %v1890_v38 = vcombine.low %v1882_v51, %v1889_v3  ;;  %v1923_v9 = vcombine.low %v1901_v33, %v1908_v35  ;;  %v1481_v41 = vrot.slane %v1107_v16, %v3597_v34  ;;  %v1485_v40 = vrot.slane %v1107_v16, %v3604_v52 }
 0x304   : > { %v1924_v62 = vcombine.low %v1915_v50, %v1922_v32  ;;  %v2136_v53 = vcombine.low %v1457_v59, %v1461_v13  ;;  %v2137_v63 = vcombine.low %v1465_v24, %v1469_v31  ;;  %v2138_v46 = vcombine.low %v1473_v54, %v1477_v19 }
 0x305   : > { %2443 = vperm.xlu1 %3024, %v1890_v38   ;;  %v1931_v1 = vrot.slane %v1923_v9, %v3716_v8  ;;  %v2139_v11 = vcombine.low %v1481_v41, %v1485_v40  ;;  %v1489_v27 = vrot.slane %v1109_v28, %v3433_v48  ;;  %v1493_v26 = vrot.slane %v1109_v28, %v3425_v45 }
 0x306   : > { %v1938_v20 = vrot.slane %v1924_v62, %v3716_v8  ;;  %v2146_v22 = vrot.slane %v2136_v53, %v3716_v8  ;;  %v2153_v55 = vrot.slane %v2137_v63, %v3716_v8  ;;  %v2160_v36 = vrot.slane %v2138_v46, %v3716_v8 }
 0x307   : > { %v2167_v15 = vrot.slane %v2139_v11, %v3716_v8  ;;  %v1497_v17 = vrot.slane %v1109_v28, %v3430_v47  ;;  %v1501_v21 = vrot.slane %v1109_v28, %v3479_v4  ;;  %v1505_v30 = vrot.slane %v1109_v28, %v3530_v58 }
 0x308   : > { %v1939_v49 = vcombine.low %v1931_v1, %v1938_v20  ;;  %v2168_v0 = vcombine.low %v2146_v22, %v2153_v55  ;;  %v1509_v57 = vrot.slane %v1109_v28, %v3590_v23  ;;  %v1513_v5 = vrot.slane %v1109_v28, %v3597_v34  ;;  %v1111_v1 = vpop.xlane.xlu0 %1110 }
 0x309   : > { %v2169_v18 = vcombine.low %v2160_v36, %v2167_v15  ;;  %v1517_v12 = vrot.slane %v1109_v28, %v3604_v52  ;;  %v2185_v10 = vcombine.low %v1489_v27, %v1493_v26  ;;  %v2186_v16 = vcombine.low %v1497_v17, %v1501_v21 }
 0x30a   : > { %2446 = vperm.xlu0 %3025, %v1939_v49   ;;  %v2176_v25 = vrot.slane %v2168_v0, %v3716_v8  ;;  %v2187_v7 = vcombine.low %v1505_v30, %v1509_v57  ;;  %v1393_v14 = vrot.slane %v1103_v61, %v3433_v48  ;;  %v1397_v43 = vrot.slane %v1103_v61, %v3425_v45 }
 0x30b   : > { %v2183_v6 = vrot.slane %v2169_v18, %v3716_v8  ;;  %v2188_v56 = vcombine.low %v1513_v5, %v1517_v12  ;;  %v2195_v29 = vrot.slane %v2185_v10, %v3716_v8  ;;  %v2202_v39 = vrot.slane %v2186_v16, %v3716_v8 }
 0x30c   : > { %v2209_v51 = vrot.slane %v2187_v7, %v3716_v8  ;;  %v1401_v44 = vrot.slane %v1103_v61, %v3430_v47  ;;  %v1405_v60 = vrot.slane %v1103_v61, %v3479_v4  ;;  %v1409_v2 = vrot.slane %v1103_v61, %v3530_v58 }
 0x30d   : > { %v2184_v33 = vcombine.low %v2176_v25, %v2183_v6  ;;  %v2216_v59 = vrot.slane %v2188_v56, %v3716_v8  ;;  %v2217_v13 = vcombine.low %v2195_v29, %v2202_v39  ;;  %v1413_v3 = vrot.slane %v1103_v61, %v3590_v23  ;;  %v1113_v25 = vpop.xlane.xlu1 %1112 }
 0x30e   : > { %v1417_v35 = vrot.slane %v1103_v61, %v3597_v34  ;;  %v1421_v50 = vrot.slane %v1103_v61, %v3604_v52  ;;  %v2038_v24 = vcombine.low %v1393_v14, %v1397_v43  ;;  %v2039_v28 = vcombine.low %v1401_v44, %v1405_v60 }
 0x30f   : > { %2461 = vperm.xlu1 %3024, %v2184_v33   ;;  %v2218_v32 = vcombine.low %v2209_v51, %v2216_v59  ;;  %v2225_v31 = vrot.slane %v2217_v13, %v3716_v8  ;;  %v2040_v54 = vcombine.low %v1409_v2, %v1413_v3  ;;  %v1425_v19 = vrot.slane %v1105_v37, %v3433_v48 }
 0x310   : > { %v2041_v38 = vcombine.low %v1417_v35, %v1421_v50  ;;  %v2048_v9 = vrot.slane %v2038_v24, %v3716_v8  ;;  %v2055_v41 = vrot.slane %v2039_v28, %v3716_v8  ;;  %v1429_v40 = vrot.slane %v1105_v37, %v3425_v45 }
 0x311   : > { %v2232_v62 = vrot.slane %v2218_v32, %v3716_v8  ;;  %v2062_v53 = vrot.slane %v2040_v54, %v3716_v8  ;;  %v1433_v63 = vrot.slane %v1105_v37, %v3430_v47  ;;  %v1437_v46 = vrot.slane %v1105_v37, %v3479_v4  ;;  %v1115_v32 = vpop.xlane.xlu0 %1114 }
 0x312   : > { %v2069_v11 = vrot.slane %v2041_v38, %v3716_v8  ;;  %v2070_v27 = vcombine.low %v2048_v9, %v2055_v41  ;;  %v1441_v26 = vrot.slane %v1105_v37, %v3530_v58  ;;  %v1445_v20 = vrot.slane %v1105_v37, %v3590_v23 }
 0x313   : > { %v2233_v22 = vcombine.low %v2225_v31, %v2232_v62  ;;  %v1449_v55 = vrot.slane %v1105_v37, %v3597_v34  ;;  %v1453_v36 = vrot.slane %v1105_v37, %v3604_v52  ;;  %v2087_v61 = vcombine.low %v1425_v19, %v1429_v40 }
 0x314   : > { %v2071_v15 = vcombine.low %v2062_v53, %v2069_v11  ;;  %v2078_v17 = vrot.slane %v2070_v27, %v3716_v8  ;;  %v2088_v21 = vcombine.low %v1433_v63, %v1437_v46  ;;  %v2089_v30 = vcombine.low %v1441_v26, %v1445_v20 }
 0x315   : > { %2464 = vperm.xlu0 %3025, %v2233_v22   ;;  %v2090_v49 = vcombine.low %v1449_v55, %v1453_v36  ;;  %v2097_v0 = vrot.slane %v2087_v61, %v3716_v8  ;;  %v1521_v57 = vrot.slane %v1111_v1, %v3433_v48  ;;  %v1525_v5 = vrot.slane %v1111_v1, %v3425_v45 }
 0x316   : > { %v2085_v18 = vrot.slane %v2071_v15, %v3716_v8  ;;  %v2104_v12 = vrot.slane %v2088_v21, %v3716_v8  ;;  %v2111_v10 = vrot.slane %v2089_v30, %v3716_v8  ;;  %v1529_v16 = vrot.slane %v1111_v1, %v3430_v47  ;;  %v1117_v15 = vpop.xlane.xlu1 %1116 }
 0x317   : > { %v2118_v7 = vrot.slane %v2090_v49, %v3716_v8  ;;  %v1533_v14 = vrot.slane %v1111_v1, %v3479_v4  ;;  %v1537_v43 = vrot.slane %v1111_v1, %v3530_v58  ;;  %v1541_v6 = vrot.slane %v1111_v1, %v3590_v23 }
 0x318   : > { %v2086_v56 = vcombine.low %v2078_v17, %v2085_v18  ;;  %v2119_v29 = vcombine.low %v2097_v0, %v2104_v12  ;;  %v1545_v39 = vrot.slane %v1111_v1, %v3597_v34  ;;  %v1549_v37 = vrot.slane %v1111_v1, %v3604_v52 }
 0x319   : > { %v2120_v51 = vcombine.low %v2111_v10, %v2118_v7  ;;  %v2234_v44 = vcombine.low %v1521_v57, %v1525_v5  ;;  %v2235_v60 = vcombine.low %v1529_v16, %v1533_v14  ;;  %v2236_v2 = vcombine.low %v1537_v43, %v1541_v6 }
 0x31a   : > { %2455 = vperm.xlu1 %3024, %v2086_v56   ;;  %v2127_v33 = vrot.slane %v2119_v29, %v3716_v8  ;;  %v2237_v59 = vcombine.low %v1545_v39, %v1549_v37  ;;  %v1553_v13 = vrot.slane %v1113_v25, %v3433_v48  ;;  %v1557_v3 = vrot.slane %v1113_v25, %v3425_v45 }
 0x31b   : > { %v2134_v35 = vrot.slane %v2120_v51, %v3716_v8  ;;  %v2244_v50 = vrot.slane %v2234_v44, %v3716_v8  ;;  %v2251_v24 = vrot.slane %v2235_v60, %v3716_v8  ;;  %v2258_v28 = vrot.slane %v2236_v2, %v3716_v8 }
 0x31c   : > { %v2265_v31 = vrot.slane %v2237_v59, %v3716_v8  ;;  %v1561_v54 = vrot.slane %v1113_v25, %v3430_v47  ;;  %v1565_v19 = vrot.slane %v1113_v25, %v3479_v4  ;;  %v1569_v38 = vrot.slane %v1113_v25, %v3530_v58 }
 0x31d   : > { %v2135_v9 = vcombine.low %v2127_v33, %v2134_v35  ;;  %v2266_v41 = vcombine.low %v2244_v50, %v2251_v24  ;;  %v1573_v40 = vrot.slane %v1113_v25, %v3590_v23  ;;  %v1577_v62 = vrot.slane %v1113_v25, %v3597_v34 }
 0x31e   : > { %v2267_v53 = vcombine.low %v2258_v28, %v2265_v31  ;;  %v1581_v63 = vrot.slane %v1113_v25, %v3604_v52  ;;  %v2283_v46 = vcombine.low %v1553_v13, %v1557_v3  ;;  %v2284_v1 = vcombine.low %v1561_v54, %v1565_v19 }
 0x31f   : > { %2458 = vperm.xlu0 %3025, %v2135_v9   ;;  %v2274_v11 = vrot.slane %v2266_v41, %v3716_v8  ;;  %v2285_v27 = vcombine.low %v1569_v38, %v1573_v40  ;;  %v1585_v26 = vrot.slane %v1115_v32, %v3433_v48  ;;  %v1589_v20 = vrot.slane %v1115_v32, %v3425_v45  ;;  %v2610_v41 = vld [vmem:[%s4087_s5] sm:$0xff]  ;;  %v2611_v40 = vld [vmem:[%s4087_s5 + $0x8] sm:$0xff] }
 0x320   : > { %v2281_v22 = vrot.slane %v2267_v53, %v3716_v8  ;;  %v2286_v55 = vcombine.low %v1577_v62, %v1581_v63  ;;  %v2293_v36 = vrot.slane %v2283_v46, %v3716_v8  ;;  %v2300_v61 = vrot.slane %v2284_v1, %v3716_v8  ;;  %v2612_v53 = vld [vmem:[%s4087_s5 + $0x10] sm:$0xff]  ;;  %v2613_v63 = vld [vmem:[%s4087_s5 + $0x18] sm:$0xff] }
 0x321   : > { %v2307_v17 = vrot.slane %v2285_v27, %v3716_v8  ;;  %v1593_v21 = vrot.slane %v1115_v32, %v3430_v47  ;;  %v1597_v30 = vrot.slane %v1115_v32, %v3479_v4  ;;  %v1601_v49 = vrot.slane %v1115_v32, %v3530_v58 }
 0x322   : > { %v2282_v0 = vcombine.low %v2274_v11, %v2281_v22  ;;  %v2314_v57 = vrot.slane %v2286_v55, %v3716_v8  ;;  %v2315_v5 = vcombine.low %v2293_v36, %v2300_v61  ;;  %v1605_v18 = vrot.slane %v1115_v32, %v3590_v23  ;;  %v2616_v55 = vld [vmem:[%s4087_s5 + $0x30] sm:$0xff]  ;;  %v2617_v36 = vld [vmem:[%s4087_s5 + $0x38] sm:$0xff] }
 0x323   : > { %v1609_v12 = vrot.slane %v1115_v32, %v3597_v34  ;;  %v1613_v10 = vrot.slane %v1115_v32, %v3604_v52  ;;  %v2332_v16 = vcombine.low %v1585_v26, %v1589_v20  ;;  %v2333_v25 = vcombine.low %v1593_v21, %v1597_v30  ;;  %v2614_v26 = vld [vmem:[%s4087_s5 + $0x20] sm:$0xff]  ;;  %v2615_v20 = vld [vmem:[%s4087_s5 + $0x28] sm:$0xff] }
 0x324   : > { %2467 = vperm.xlu1 %3024, %v2282_v0   ;;  %v2316_v7 = vcombine.low %v2307_v17, %v2314_v57  ;;  %v2323_v14 = vrot.slane %v2315_v5, %v3716_v8  ;;  %v2334_v43 = vcombine.low %v1601_v49, %v1605_v18  ;;  %v1617_v6 = vrot.slane %v1117_v15, %v3433_v48  ;;  %v2618_v17 = vld [vmem:[%s4087_s5 + $0x40] sm:$0xff]  ;;  %v2619_v21 = vld [vmem:[%s4087_s5 + $0x48] sm:$0xff]  ;;  %v2620_v0 = vld [vmem:[%s4087_s5 + $0x50] sm:$0xff] }
 0x325   : > { %v2335_v56 = vcombine.low %v1609_v12, %v1613_v10  ;;  %v2342_v29 = vrot.slane %v2332_v16, %v3716_v8  ;;  %v2349_v39 = vrot.slane %v2333_v25, %v3716_v8  ;;  %v1621_v37 = vrot.slane %v1117_v15, %v3425_v45  ;;  %v2621_v57 = vld [vmem:[%s4087_s5 + $0x58] sm:$0xff]  ;;  %v2622_v18 = vld [vmem:[%s4087_s5 + $0x60] sm:$0xff]  ;;  %v2623_v12 = vld [vmem:[%s4087_s5 + $0x68] sm:$0xff] }
 0x326   : > { %v2330_v51 = vrot.slane %v2316_v7, %v3716_v8  ;;  %v2356_v44 = vrot.slane %v2334_v43, %v3716_v8  ;;  %v1625_v60 = vrot.slane %v1117_v15, %v3430_v47  ;;  %v1629_v2 = vrot.slane %v1117_v15, %v3479_v4  ;;  %v2624_v16 = vld [vmem:[%s4087_s5 + $0x70] sm:$0xff]  ;;  %v2625_v25 = vld [vmem:[%s4087_s5 + $0x78] sm:$0xff] }
 0x327   : > { %v2363_v33 = vrot.slane %v2335_v56, %v3716_v8  ;;  %v2364_v59 = vcombine.low %v2342_v29, %v2349_v39  ;;  %v1633_v48 = vrot.slane %v1117_v15, %v3530_v58  ;;  %v1637_v13 = vrot.slane %v1117_v15, %v3590_v23 }
 0x328   : > { %v2331_v3 = vcombine.low %v2323_v14, %v2330_v51  ;;  %v1641_v35 = vrot.slane %v1117_v15, %v3597_v34  ;;  %v1645_v45 = vrot.slane %v1117_v15, %v3604_v52  ;;  %v2381_v50 = vcombine.low %v1617_v6, %v1621_v37 }
 0x329   : > { %v2365_v24 = vcombine.low %v2356_v44, %v2363_v33  ;;  %v2372_v28 = vrot.slane %v2364_v59, %v3716_v8  ;;  %v2382_v32 = vcombine.low %v1625_v60, %v1629_v2  ;;  %v2383_v47 = vcombine.low %v1633_v48, %v1637_v13 }
 0x32a   : > { %2470 = vperm.xlu0 %3025, %v2331_v3   ;;  %v2384_v4 = vcombine.low %v1641_v35, %v1645_v45  ;;  %v2391_v31 = vrot.slane %v2381_v50, %v3716_v8  ;;  %v3123_v1 = vmov 0.0|0.0   ;;  %v2892_v11 = vpack.c.bf16 %v2611_v40, %v2610_v41 }
 0x32b   : > { %v2379_v54 = vrot.slane %v2365_v24, %v3716_v8  ;;  %v2398_v58 = vrot.slane %v2382_v32, %v3716_v8  ;;  %v2405_v23 = vrot.slane %v2383_v47, %v3716_v8  ;;  %2891 = vmatprep.subr.bf16.mxu1 %v3123_v1  ;;  %v2895_v27 = vpack.c.bf16 %v2613_v63, %v2612_v53 }
 0x32c   : > { %v2412_v34 = vrot.slane %v2384_v4, %v3716_v8  ;;  %2893 = vmatpush3.bf16.msra.mxu1 %v2892_v11  ;;  %v2898_v22 = vpack.c.bf16 %v2615_v20, %v2614_v26  ;;  %v3124_v61 = vmov -inf   ;;  %v2901_v15 = vpack.c.bf16 %v2617_v36, %v2616_v55 }
 0x32d   : > { %v2380_v19 = vcombine.low %v2372_v28, %v2379_v54  ;;  %v2413_v52 = vcombine.low %v2391_v31, %v2398_v58  ;;  %2894 = vmatprep.subr.bf16.mxu1 %v3123_v1  ;;  %301 = vst [vmem:[#allocation2] sm:$0x1] %v3124_v61  ;;  %v3126_v30 = vmov 0.0   ;;  %v2904_v49 = vpack.c.bf16 %v2619_v21, %v2618_v17 }
 0x32e   : > { %v2414_v38 = vcombine.low %v2405_v23, %v2412_v34  ;;  %2888 = vmatprep.mubr.msk.f32.mxu1 %vm3125_vm1, %v3126_v30  ;;  %v2907_v5 = vpack.c.bf16 %v2621_v57, %v2620_v0  ;;  %v2910_v10 = vpack.c.bf16 %v2623_v12, %v2622_v18  ;;  %v2913_v7 = vpack.c.bf16 %v2625_v25, %v2624_v16 }
 0x32f   : > { %2473 = vperm.xlu1 %3024, %v2380_v19   ;;  %v2421_v9 = vrot.slane %v2413_v52, %v3716_v8  ;;  %v4093_v6 = vlaneseq }
 0x330   : > { %v2428_v62 = vrot.slane %v2414_v38, %v3716_v8  ;;  %2896 = vmatpush3.bf16.msra.mxu1 %v2895_v27 }
 0x331   : > { %2897 = vmatprep.subr.bf16.mxu1 %v3123_v1  ;;  %v3991_v56 = vand.u32 127, %v4093_v6 }
 0x332   : > { %v2429_v46 = vcombine.low %v2421_v9, %v2428_v62 }
 0x333   : > { %v2484_v39 = vadd.s32 4294967288, %v3991_v56  ;;  %v2491_v60 = vadd.s32 4294967280, %v3991_v56  ;;  %v2482_v2 = vsub.s32 %v3991_v56, %v3415_v42  ;;  %v2498_v33 = vadd.s32 4294967272, %v3991_v56 }
 0x334   : > { %2476 = vperm.xlu0 %3025, %v2429_v46   ;;  %2899 = vmatpush3.bf16.msra.mxu1 %v2898_v22  ;;  %v2505_v59 = vadd.s32 4294967264, %v3991_v56  ;;  %v2512_v24 = vadd.s32 4294967256, %v3991_v56  ;;  %v2519_v23 = vadd.s32 4294967248, %v3991_v56  ;;  %v2533_v52 = vadd.s32 4294967232, %v3991_v56 }
 0x335   : > { %2900 = vmatprep.subr.bf16.mxu1 %v3123_v1  ;;  %v2487_v51 = vsub.s32 %v2484_v39, %v3415_v42  ;;  %v2494_v3 = vsub.s32 %v2491_v60, %v3415_v42  ;;  %v2501_v45 = vsub.s32 %v2498_v33, %v3415_v42  ;;  %v2526_v9 = vadd.s32 4294967240, %v3991_v56 }
 0x336   : > { %v2508_v28 = vsub.s32 %v2505_v59, %v3415_v42  ;;  %v2515_v31 = vsub.s32 %v2512_v24, %v3415_v42  ;;  %v2522_v40 = vsub.s32 %v2519_v23, %v3415_v42  ;;  %v2540_v63 = vadd.s32 4294967224, %v3991_v56 }
 0x337   : > { %v2536_v46 = vsub.s32 %v2533_v52, %v3415_v42  ;;  %v2547_v55 = vadd.s32 4294967216, %v3991_v56  ;;  %v2554_v17 = vadd.s32 4294967208, %v3991_v56  ;;  %v2561_v57 = vadd.s32 4294967200, %v3991_v56 }
 0x338   : > { %2902 = vmatpush3.bf16.msra.mxu1 %v2901_v15  ;;  %v2543_v20 = vsub.s32 %v2540_v63, %v3415_v42  ;;  %v2568_v12 = vadd.s32 4294967192, %v3991_v56  ;;  %v2582_v60 = vadd.s32 4294967176, %v3991_v56 }
 0x339   : > { %2903 = vmatprep.subr.bf16.mxu1 %v3123_v1  ;;  %v2564_v16 = vsub.s32 %v2561_v57, %v3415_v42 }
 0x33a   : > { %v2571_v6 = vsub.s32 %v2568_v12, %v3415_v42 }
 0x33c   : > { %2905 = vmatpush3.bf16.msra.mxu1 %v2904_v49  ;;  %v2550_v49 = vsub.s32 %v2547_v55, %v3415_v42 }
 0x33d   : > { %2906 = vmatprep.subr.bf16.mxu1 %v3123_v1 }
 0x340   : > { %2908 = vmatpush3.bf16.msra.mxu1 %v2907_v5  ;;  %v2557_v5 = vsub.s32 %v2554_v17, %v3415_v42 }
 0x341   : > { %2909 = vmatprep.subr.bf16.mxu1 %v3123_v1 }
 0x344   : > { %2911 = vmatpush3.bf16.msra.mxu1 %v2910_v10 }
 0x345   : > { %2912 = vmatprep.subr.bf16.mxu1 %v3123_v1  ;;  %v2529_v1 = vsub.s32 %v2526_v9, %v3415_v42 }
 0x348   : > { %2914 = vmatpush3.bf16.msra.mxu1 %v2913_v7 }
 0x365   : > { %v2438_v14 = vpop.permute.xlu1 %2437 }
 0x366   : > { %v2495_v47 = vrot.slane %v2438_v14, %v2494_v3  ;;  %v2575_v14 = vadd.s32 4294967184, %v3991_v56 }
 0x369   : > { %v2432_v43 = vpop.permute.xlu0 %2431 }
 0x36a   : > { %v2483_v35 = vrot.slane %v2432_v43, %v2482_v2 }
 0x36f   : > { %v2435_v29 = vpop.permute.xlu1 %2434 }
 0x370   : > { %v2488_v48 = vrot.slane %v2435_v29, %v2487_v51  ;;  %v2578_v51 = vsub.s32 %v2575_v14, %v3415_v42 }
 0x372   : > { %v2490_v32 = vsel %vm2489_vm2, %v2488_v48, %v2483_v35 }
 0x373   : > { %v2497_v58 = vsel %vm2496_vm3, %v2495_v47, %v2490_v32 }
 0x374   : > { %v2441_v37 = vpop.permute.xlu0 %2440 }
 0x375   : > { %v2502_v4 = vrot.slane %v2441_v37, %v2501_v45 }
 0x377   : > { %v2504_v38 = vsel %vm2503_vm4, %v2502_v4, %v2497_v58 }
 0x379   : > { %v2450_v44 = vpop.permute.xlu1 %2449 }
 0x37a   : > { %v2523_v26 = vrot.slane %v2450_v44, %v2522_v40 }
 0x37f   : > { %v2453_v13 = vpop.permute.xlu0 %2452 }
 0x380   : > { %v2530_v61 = vrot.slane %v2453_v13, %v2529_v1  ;;  %v2585_v13 = vsub.s32 %v2582_v60, %v3415_v42  ;;  %v2626_v42 = vld [vmem:[%s4088_s6] sm:$0x1] }
 0x384   : > { %v2444_v50 = vpop.permute.xlu1 %2443 }
 0x385   : > { %v2509_v34 = vrot.slane %v2444_v50, %v2508_v28  ;;  %v1085_v28 = vld [vmem:[#allocation2] sm:$0x1] }
 0x387   : > { %v2511_v62 = vsel %vm2510_vm5, %v2509_v34, %v2504_v38 }
 0x389   : > { %v2447_v54 = vpop.permute.xlu0 %2446 }
 0x38a   : > { %v2516_v41 = vrot.slane %v2447_v54, %v2515_v31 }
 0x38c   : > { %v2518_v11 = vsel %vm2517_vm6, %v2516_v41, %v2511_v62 }
 0x38d   : > { %v2525_v22 = vsel %vm2524_vm7, %v2523_v26, %v2518_v11 }
 0x38e   : > { %v2462_v19 = vpop.permute.xlu1 %2461  ;;  %v2532_v21 = vsel %vm2531_vm8, %v2530_v61, %v2525_v22 }
 0x38f   : > { %v2551_v10 = vrot.slane %v2462_v19, %v2550_v49 }
 0x394   : > { %v2465_v53 = vpop.permute.xlu0 %2464 }
 0x395   : > { %v2558_v43 = vrot.slane %v2465_v53, %v2557_v5 }
 0x399   : > { %v2456_v27 = vpop.permute.xlu1 %2455 }
 0x39a   : > { %v2537_v36 = vrot.slane %v2456_v27, %v2536_v46 }
 0x39c   : > { %v2539_v0 = vsel %vm2538_vm9, %v2537_v36, %v2532_v21 }
 0x39e   : > { %v2459_v15 = vpop.permute.xlu0 %2458 }
 0x39f   : > { %v2544_v30 = vrot.slane %v2459_v15, %v2543_v20 }
 0x3a1   : > { %v2546_v18 = vsel %vm2545_vm10, %v2544_v30, %v2539_v0 }
 0x3a2   : > { %v2553_v7 = vsel %vm2552_vm11, %v2551_v10, %v2546_v18 }
 0x3a3   : > { %v2468_v25 = vpop.permute.xlu1 %2467  ;;  %v2560_v37 = vsel %vm2559_vm12, %v2558_v43, %v2553_v7 }
 0x3a4   : > { %v2565_v29 = vrot.slane %v2468_v25, %v2564_v16 }
 0x3a6   : > { %v2567_v2 = vsel %vm2566_vm13, %v2565_v29, %v2560_v37 }
 0x3a9   : > { %v2471_v39 = vpop.permute.xlu0 %2470 }
 0x3aa   : > { %v2572_v44 = vrot.slane %v2471_v39, %v2571_v6 }
 0x3ac   : > { %v2574_v48 = vsel %vm2573_vm14, %v2572_v44, %v2567_v2 }
 0x3ae   : > { %v2474_v33 = vpop.permute.xlu1 %2473 }
 0x3af   : > { %v2579_v59 = vrot.slane %v2474_v33, %v2578_v51 }
 0x3b1   : > { %v2581_v3 = vsel %vm2580_vm15, %v2579_v59, %v2574_v48 }
 0x3b3   : > { %v2477_v35 = vpop.permute.xlu0 %2476 }
 0x3b4   : > { %v2586_v45 = vrot.slane %v2477_v35, %v2585_v13 }
 0x3b6   : > { %v2588_v50 = vsel %vm2587_vm0, %v2586_v45, %v2581_v3 }
 0x3b7   : > { %v2595_v24 = vrot.slane %v2588_v50, %v3716_v8 }
 0x3b9   : > { %v2602_v56 = vrot.slane %v2595_v24, %v3716_v8 }
 0x3bb   : > { %v2604_v32 = vmax.f32 %v1085_v28, %v2602_v56 }
 0x3bd   : > { %2605 = vst [vmem:[#allocation2] sm:$0x1] %v2604_v32 }
 0x3c4   : > { %v2609_v47 = vld [vmem:[#allocation2] sm:$0x1] }
 0x3c5   : > { %2889 = vmatmul.mubr.f32.vlgmr.msra.gmra.mrb[0].mxu1 %v2609_v47 }
 0x498   : > { %v2693_v4 = vpop.f32.mrb[0].mxu1 }
 0x499   : > { %v2694_v31 = vadd.f32 %v2693_v4, %v2626_v42  ;;  %v2890_v54 = vpop.f32.mrb[1].mxu1 }
 0x49b   : > { %v2697_v58 = vmax.f32 %v2694_v31, 0.0 }
 0x49d   : > { %2698 = vst [vmem:[%s288_s19] sm:$0x1] %v2697_v58 }
 0x49e   : > { %3047 = shalt.err (!%p3044_p5)
}
 0x49f   : > { %s3048_s15 = scalar_lea.hbm %s4035_s23, 16  ;;  %s3052_s18 = scalar_lea.hbm %s4089_s7, 32 }
 0x4a0   : > { %p3049_p6 = scmp.ne.s32.totalorder %s4035_s23, %s3048_s15  ;;  %p3053_p10 = scmp.lt.u32.totalorder %s4035_s23, %s4089_s7 }
 0x4a1   : > { %p3054_p11 = scmp.lt.u32.totalorder %s3052_s18, %s3048_s15  ;;  %p3056_p13 = scmp.lt.u32.totalorder %s3048_s15, %s4035_s23 }
 0x4a2   : > { %p3050_p7 = pnand %p3049_p6, %p3208_p4 }
 0x4a3   : > { %p3055_p12 = por %p3054_p11, %p3053_p10 }
 0x4a4   : > { %p3051_p9 = pneg %p3050_p7 }
 0x4a5   : > { %p3057_p0 = por %p3056_p13, %p3055_p12 }
 0x4a7   : > { %p3058_p1 = pnand %p3057_p0, %p3051_p9 }
 0x4a9   : > { %3061 = shalt.err (!%p3058_p1)
}
 0x4aa   : > { %2915 = dma.vmem_to_hbm [thread:$0]  (%p3208_p4), %s4037_s20, 16, %s4035_s23, %s2700_s30  }
 0x4ab PF: > { %p2921_p2 = scmp.ge.s32.totalorder %s3112_s29, 2  ;;  %s2724_s22 = sand.u32 1, %s3092_s24  }
 0x4ac   : > { %s2725_s8 = scalar_lea.sflag [#allocation4], %s2724_s22 }
 0x4ad   : > { %p2918_p3 = pnand %p2921_p2, %p3215_p8 }
 0x4af   : > { %3087 = dma.done.wait (!%p2918_p3), %s2725_s8, 16  }
 0x4b0   : > { %3089 = vsyncadd (!%p2918_p3), %s2725_s8, 4294967280  ;;  %s20_s29 = sadd.s32 1, %s3112_s29   ;;  %s4094_s24 = smov %s3096_s25 }
 0x4b1   : > { %p17_p5 = scmp.ge.s32.totalorder %s20_s29, 4   ;;  %s4095_s25 = smov %s3100_s26 }
 0x4b2   : > { %s4096_s26 = smov %s3221_s14  ;;  %s4097_s27 = smov %s3108_s28 }
 0x4b3   : > { %s4098_s28 = smov %s4100_s9  ;;  %19 = sbr.rel (!%p17_p5) target bundleno = 4 (0x4), region = 91 }
 0x4ba   :  { %2729 = vsyncpa [#allocation4], 1 }
 0x4bb   :  { %2731 = vsyncpa [#allocation4 + $0x1], 1 }

</bundles_post_ra>
